<compile_context>
chip_gen: v6e
topology: v6e:2x2x1
jax: 0.10.0
libtpu: 0.0.40
codegen_flags: <defaults>
</compile_context>

<pallas_src>
import jax
import jax.numpy as jnp
from jax.experimental import pallas as pl
from jax.experimental.pallas import tpu as pltpu

OP_NAMES = ('none', 'skip_connect', 'nor_conv_1x1', 'nor_conv_3x3',
            'avg_pool_3x3')
BN_EPS = 1e-5
# tap order t = (dh+1)*3 + (dw+1)  <->  conv kernel index (kh, kw)
_OFFSETS = tuple((dh, dw) for dh in (-1, 0, 1) for dw in (-1, 0, 1))


# ----------------------------------------------------------------------------
# Fused whole-cell Pallas kernel
# ----------------------------------------------------------------------------
def _make_cell_kernel(H, W, max_nodes, edge2index):
    HW = H * W

    def kernel(wskip_ref,    # SMEM (E,)         arch weight of skip_connect
               x_ref,        # VMEM (1, C, HW)   cell input (one sample)
               wconv_ref,    # VMEM (E, 9, C, C) conv weights (BN+arch folded)
               bconv_ref,    # VMEM (E, C, 1)    conv bias (BN+arch folded)
               invw_ref,     # VMEM (E, 1, HW)   w_pool / valid-count per pos
               masks_ref,    # VMEM (9, 1, HW)   zero-pad boundary masks
               out_ref):     # VMEM (1, C, HW)
        x = x_ref[0]                                        # (C, HW)

        def taps_and_pool(v):
            """9 relu'd 3x3 taps of v (each (C, HW)) + raw tap sum (pooling)."""
            taps, pool = [], None
            for t, (dh, dw) in enumerate(_OFFSETS):
                s = dh * W + dw
                if s == 0:
                    tap = v                                 # center tap
                else:
                    # tap[:, r] = v[:, r + s] (zero outside the image):
                    # cyclic lane roll + boundary mask == zero-padded shift.
                    tap = pltpu.roll(v, (-s) % HW, 1) * masks_ref[t]
                pool = tap if pool is None else pool + tap  # raw (no ReLU)
                taps.append(jnp.maximum(tap, 0.0))          # ReLU for the convs
            return taps, pool

        def mixed_edge(e, v, taps, pool):
            # skip_connect + avg_pool_3x3 + folded BN bias: VPU terms
            acc = wskip_ref[e] * v + pool * invw_ref[e] + bconv_ref[e]
            # nor_conv_3x3 (+ nor_conv_1x1 folded into the center tap): MXU
            for t in range(9):
                acc = acc + jnp.dot(wconv_ref[e, t], taps[t],
                                    preferred_element_type=jnp.float32)
            return acc                                      # 'none' = w0 * 0 dropped

        # node DAG; every feature stays in VMEM / vregs
        accs = [None] * max_nodes
        accs[0] = x
        for j in range(max_nodes - 1):          # source node (final when reached)
            v = accs[j]
            taps, pool = taps_and_pool(v)       # shared by all outgoing edges
            for i in range(j + 1, max_nodes):   # target node
                e = edge2index['{:}<-{:}'.format(i, j)]
                contrib = mixed_edge(e, v, taps, pool)
                accs[i] = contrib if accs[i] is None else accs[i] + contrib
        out_ref[0] = accs[max_nodes - 1]

    return kernel


# ----------------------------------------------------------------------------
# Wrapper-side constants / parameter folding (pure data-layout glue)
# ----------------------------------------------------------------------------
def pool_inv_counts(H, W):
    """(1, H*W): 1 / (# valid elements of each 3x3 window), count_include_pad=False."""
    ch = (3.0 - (jnp.arange(H) == 0).astype(jnp.float32)
              - (jnp.arange(H) == H - 1).astype(jnp.float32))
    cw = (3.0 - (jnp.arange(W) == 0).astype(jnp.float32)
              - (jnp.arange(W) == W - 1).astype(jnp.float32))
    return (1.0 / (ch[:, None] * cw[None, :])).reshape(1, H * W)


def tap_masks(H, W):
    """(9, 1, H*W) 0/1 masks: source pixel of tap (dh, dw) lies inside the image."""
    r = jnp.arange(H * W)
    hh, ww = r // W, r % W
    masks = []
    for dh, dw in _OFFSETS:
        ok = (hh + dh >= 0) & (hh + dh < H) & (ww + dw >= 0) & (ww + dw < W)
        masks.append(ok.astype(jnp.float32).reshape(1, H * W))
    return jnp.stack(masks, axis=0)


def init_edge_params(key, C):
    """Deterministic per-edge parameters in PyTorch layouts (fresh BN stats)."""
    k1, k2 = jax.random.split(key)
    return dict(
        w1=jax.random.normal(k1, (C, C, 1, 1), jnp.float32) * 0.1,   # (Cout,Cin,1,1)
        w3=jax.random.normal(k2, (C, C, 3, 3), jnp.float32) * 0.1,   # (Cout,Cin,3,3)
        bn1_mean=jnp.zeros((C,), jnp.float32),
        bn1_var=jnp.ones((C,), jnp.float32),
        bn3_mean=jnp.zeros((C,), jnp.float32),
        bn3_var=jnp.ones((C,), jnp.float32))


# ----------------------------------------------------------------------------
# The cell
# ----------------------------------------------------------------------------
class NAS201SearchCellPallas:
    def __init__(self, C_in, C_out, stride, max_nodes, op_names=OP_NAMES,
                 key=None):
        assert C_in == C_out and stride == 1, \
            "this Pallas implementation covers the stride=1, C_in==C_out cell"
        assert tuple(op_names) == OP_NAMES
        self.C = C_in
        self.max_nodes = max_nodes
        self.edge_keys = sorted('{:}<-{:}'.format(i, j)
                                for i in range(1, max_nodes) for j in range(i))
        self.edge2index = {k: i for i, k in enumerate(self.edge_keys)}
        self.num_edges = len(self.edge_keys)
        if key is None:
            key = jax.random.PRNGKey(0)
        keys = jax.random.split(key, self.num_edges)
        self.params = {k: init_edge_params(keys[i], C_in)
                       for i, k in enumerate(self.edge_keys)}
        self._forward = jax.jit(self._forward_impl)

    # fold eval-mode BN + architecture weights into the per-edge constants
    def _fold(self, weightss, H, W):
        C = self.C
        inv_cnt = pool_inv_counts(H, W)                              # (1, HW)
        wconv, bconv, wskip, invw = [], [], [], []
        for ek in self.edge_keys:
            p = self.params[ek]
            a = weightss[self.edge2index[ek]]                        # (5,)
            s1 = jax.lax.rsqrt(p['bn1_var'] + BN_EPS); b1 = -p['bn1_mean'] * s1
            s3 = jax.lax.rsqrt(p['bn3_var'] + BN_EPS); b3 = -p['bn3_mean'] * s3
            w3 = jnp.transpose(p['w3'], (2, 3, 0, 1)).reshape(9, C, C)  # (t,Cout,Cin)
            wc = w3 * (a[3] * s3)[None, :, None]                     # arch + BN scale
            wc = wc.at[4].add(p['w1'][:, :, 0, 0] * (a[2] * s1)[:, None])  # 1x1 -> center
            wconv.append(wc)
            bconv.append((a[2] * b1 + a[3] * b3).reshape(C, 1))
            wskip.append(a[1])
            invw.append(a[4] * inv_cnt)
        return (jnp.stack(wskip).astype(jnp.float32), jnp.stack(wconv),
                jnp.stack(bconv), jnp.stack(invw))

    def _forward_impl(self, x_nchw, weightss):
        N, C, H, W = x_nchw.shape
        assert C == self.C
        HW = H * W
        E = self.num_edges
        x2d = x_nchw.reshape(N, C, HW)            # NCHW -> (N, C, HW): HW on lanes
        wskip, wconv, bconv, invw = self._fold(weightss, H, W)
        masks = tap_masks(H, W)
        kernel = _make_cell_kernel(H, W, self.max_nodes, self.edge2index)
        out2d = pl.pallas_call(
            kernel,
            out_shape=jax.ShapeDtypeStruct((N, C, HW), jnp.float32),
            grid=(N,),
            in_specs=[
                pl.BlockSpec(memory_space=pltpu.MemorySpace.SMEM),     # wskip (E,)
                pl.BlockSpec((1, C, HW), lambda n: (n, 0, 0)),         # x per sample
                pl.BlockSpec((E, 9, C, C), lambda n: (0, 0, 0, 0)),    # wconv (resident)
                pl.BlockSpec((E, C, 1), lambda n: (0, 0, 0)),          # bconv
                pl.BlockSpec((E, 1, HW), lambda n: (0, 0, 0)),         # invw
                pl.BlockSpec((9, 1, HW), lambda n: (0, 0, 0)),         # tap masks
            ],
            out_specs=pl.BlockSpec((1, C, HW), lambda n: (n, 0, 0)),
            compiler_params=pltpu.CompilerParams(
                dimension_semantics=("parallel",)),   # 2-TC split on v7x
        )(wskip, x2d, wconv, bconv, invw, masks)
        return out2d.reshape(N, C, H, W)

    def __call__(self, x_nchw, weightss):
        return self._forward(x_nchw, weightss)

    # --- independent pure-JAX reference of the same forward (verification) ---
    def reference(self, x_nchw, weightss):
        high = jax.lax.Precision.HIGHEST

        def bn_eval(y, mean, var):
            return ((y - mean[None, :, None, None])
                    * jax.lax.rsqrt(var + BN_EPS)[None, :, None, None])

        def conv(y, w):
            pad = (w.shape[-1] - 1) // 2
            return jax.lax.conv_general_dilated(
                y, w, window_strides=(1, 1), padding=[(pad, pad), (pad, pad)],
                dimension_numbers=('NCHW', 'OIHW', 'NCHW'), precision=high)

        def avg_pool3(y):
            n, c, h, w = y.shape
            yp = jnp.pad(y, ((0, 0), (0, 0), (1, 1), (1, 1)))
            s = sum(yp[:, :, dh:dh + h, dw:dw + w]
                    for dh in range(3) for dw in range(3))
            op = jnp.pad(jnp.ones((1, 1, h, w), y.dtype),
                         ((0, 0), (0, 0), (1, 1), (1, 1)))
            cnt = sum(op[:, :, dh:dh + h, dw:dw + w]
                      for dh in range(3) for dw in range(3))
            return s / cnt

        def edge_fwd(v, p, a):
            r = jnp.maximum(v, 0.0)
            c1 = bn_eval(conv(r, p['w1']), p['bn1_mean'], p['bn1_var'])
            c3 = bn_eval(conv(r, p['w3']), p['bn3_mean'], p['bn3_var'])
            return a[1] * v + a[2] * c1 + a[3] * c3 + a[4] * avg_pool3(v)

        nodes = [x_nchw]
        for i in range(1, self.max_nodes):
            acc = None
            for j in range(i):
                k = '{:}<-{:}'.format(i, j)
                c = edge_fwd(nodes[j], self.params[k],
                             weightss[self.edge2index[k]])
                acc = c if acc is None else acc + c
            nodes.append(acc)
        return nodes[-1]


# ----------------------------------------------------------------------------
if __name__ == "__main__":
    key = jax.random.PRNGKey(0)
    kx, kw, kp = jax.random.split(key, 3)

    N, C, H, W = 2, 4, 16, 16
    max_nodes = 4
    x = jax.random.normal(kx, (N, C, H, W), jnp.float32)          # NCHW input
    num_edges = sum(range(1, max_nodes))                          # 6
    weightss = jax.nn.softmax(
        jax.random.normal(kw, (num_edges, len(OP_NAMES)), jnp.float32), axis=-1)

    cell = NAS201SearchCellPallas(C_in=C, C_out=C, stride=1,
                                  max_nodes=max_nodes, key=kp)

    out = jax.block_until_ready(cell(x, weightss))
    ref = cell.reference(x, weightss)

    assert out.shape == (N, C, H, W)
    assert jnp.allclose(out, ref, atol=2e-3, rtol=2e-3), (
        "Pallas output mismatch vs reference: max abs err = %e"
        % float(jnp.max(jnp.abs(out - ref))))

    print("KERNEL_OK")
</pallas_src>

<mosaic_0001>
module attributes {stable_mosaic.version = 11 : i64} {
  func.func @kernel(%arg0: i32, %arg1: memref<6xf32, #tpu.memory_space<smem>>, %arg2: memref<1x4x256xf32, #tpu.memory_space<vmem>>, %arg3: memref<6x9x4x4xf32, #tpu.memory_space<vmem>>, %arg4: memref<6x4x1xf32, #tpu.memory_space<vmem>>, %arg5: memref<6x1x256xf32, #tpu.memory_space<vmem>>, %arg6: memref<9x1x256xf32, #tpu.memory_space<vmem>>, %arg7: memref<1x4x256xf32, #tpu.memory_space<vmem>>) attributes {dimension_semantics = [#tpu.dimension_semantics<parallel>], iteration_bounds = array<i64: 2>, scalar_prefetch = 0 : i64, scratch_operands = 0 : i64, tpu.core_type = #tpu.core_type<tc>, window_params = [{transform_indices = @transform_0, window_bounds = array<i64: 6>}, {transform_indices = @transform_1, window_bounds = array<i64: 1, 4, 256>}, {pipeline_mode = #tpu.pipeline_mode<synchronous>, transform_indices = @transform_2, window_bounds = array<i64: 6, 9, 4, 4>}, {pipeline_mode = #tpu.pipeline_mode<synchronous>, transform_indices = @transform_3, window_bounds = array<i64: 6, 4, 1>}, {pipeline_mode = #tpu.pipeline_mode<synchronous>, transform_indices = @transform_4, window_bounds = array<i64: 6, 1, 256>}, {pipeline_mode = #tpu.pipeline_mode<synchronous>, transform_indices = @transform_5, window_bounds = array<i64: 9, 1, 256>}, {transform_indices = @transform_6, window_bounds = array<i64: 1, 4, 256>}]} {
    %c0 = arith.constant 0 : index
    %c0_0 = arith.constant 0 : index
    %c0_1 = arith.constant 0 : index
    %0 = vector.load %arg2[%c0, %c0_0, %c0_1] : memref<1x4x256xf32, #tpu.memory_space<vmem>>, vector<1x4x256xf32>
    %1 = vector.shape_cast %0 : vector<1x4x256xf32> to vector<4x256xf32>
    %c17_i32 = arith.constant 17 : i32
    %2 = tpu.dynamic_rotate %1 by %c17_i32 dim 1 : vector<4x256xf32>, i32 -> vector<4x256xf32>
    %c0_2 = arith.constant 0 : index
    %c0_3 = arith.constant 0 : index
    %c0_4 = arith.constant 0 : index
    %3 = vector.load %arg6[%c0_2, %c0_3, %c0_4] : memref<9x1x256xf32, #tpu.memory_space<vmem>>, vector<1x1x256xf32>
    %4 = vector.shape_cast %3 : vector<1x1x256xf32> to vector<1x256xf32>
    %5 = vector.broadcast %4 : vector<1x256xf32> to vector<4x256xf32>
    %6 = arith.mulf %2, %5 : vector<4x256xf32>
    %cst = arith.constant 0.000000e+00 : f32
    %7 = vector.broadcast %cst : f32 to vector<4x256xf32>
    %8 = arith.maximumf %6, %7 : vector<4x256xf32>
    %c16_i32 = arith.constant 16 : i32
    %9 = tpu.dynamic_rotate %1 by %c16_i32 dim 1 : vector<4x256xf32>, i32 -> vector<4x256xf32>
    %c1 = arith.constant 1 : index
    %c0_5 = arith.constant 0 : index
    %c0_6 = arith.constant 0 : index
    %10 = vector.load %arg6[%c1, %c0_5, %c0_6] : memref<9x1x256xf32, #tpu.memory_space<vmem>>, vector<1x1x256xf32>
    %11 = vector.shape_cast %10 : vector<1x1x256xf32> to vector<1x256xf32>
    %12 = vector.broadcast %11 : vector<1x256xf32> to vector<4x256xf32>
    %13 = arith.mulf %9, %12 : vector<4x256xf32>
    %14 = arith.addf %6, %13 : vector<4x256xf32>
    %cst_7 = arith.constant 0.000000e+00 : f32
    %15 = vector.broadcast %cst_7 : f32 to vector<4x256xf32>
    %16 = arith.maximumf %13, %15 : vector<4x256xf32>
    %c15_i32 = arith.constant 15 : i32
    %17 = tpu.dynamic_rotate %1 by %c15_i32 dim 1 : vector<4x256xf32>, i32 -> vector<4x256xf32>
    %c2 = arith.constant 2 : index
    %c0_8 = arith.constant 0 : index
    %c0_9 = arith.constant 0 : index
    %18 = vector.load %arg6[%c2, %c0_8, %c0_9] : memref<9x1x256xf32, #tpu.memory_space<vmem>>, vector<1x1x256xf32>
    %19 = vector.shape_cast %18 : vector<1x1x256xf32> to vector<1x256xf32>
    %20 = vector.broadcast %19 : vector<1x256xf32> to vector<4x256xf32>
    %21 = arith.mulf %17, %20 : vector<4x256xf32>
    %22 = arith.addf %14, %21 : vector<4x256xf32>
    %cst_10 = arith.constant 0.000000e+00 : f32
    %23 = vector.broadcast %cst_10 : f32 to vector<4x256xf32>
    %24 = arith.maximumf %21, %23 : vector<4x256xf32>
    %c1_i32 = arith.constant 1 : i32
    %25 = tpu.dynamic_rotate %1 by %c1_i32 dim 1 : vector<4x256xf32>, i32 -> vector<4x256xf32>
    %c3 = arith.constant 3 : index
    %c0_11 = arith.constant 0 : index
    %c0_12 = arith.constant 0 : index
    %26 = vector.load %arg6[%c3, %c0_11, %c0_12] : memref<9x1x256xf32, #tpu.memory_space<vmem>>, vector<1x1x256xf32>
    %27 = vector.shape_cast %26 : vector<1x1x256xf32> to vector<1x256xf32>
    %28 = vector.broadcast %27 : vector<1x256xf32> to vector<4x256xf32>
    %29 = arith.mulf %25, %28 : vector<4x256xf32>
    %30 = arith.addf %22, %29 : vector<4x256xf32>
    %cst_13 = arith.constant 0.000000e+00 : f32
    %31 = vector.broadcast %cst_13 : f32 to vector<4x256xf32>
    %32 = arith.maximumf %29, %31 : vector<4x256xf32>
    %33 = arith.addf %30, %1 : vector<4x256xf32>
    %cst_14 = arith.constant 0.000000e+00 : f32
    %34 = vector.broadcast %cst_14 : f32 to vector<4x256xf32>
    %35 = arith.maximumf %1, %34 : vector<4x256xf32>
    %c255_i32 = arith.constant 255 : i32
    %36 = tpu.dynamic_rotate %1 by %c255_i32 dim 1 : vector<4x256xf32>, i32 -> vector<4x256xf32>
    %c5 = arith.constant 5 : index
    %c0_15 = arith.constant 0 : index
    %c0_16 = arith.constant 0 : index
    %37 = vector.load %arg6[%c5, %c0_15, %c0_16] : memref<9x1x256xf32, #tpu.memory_space<vmem>>, vector<1x1x256xf32>
    %38 = vector.shape_cast %37 : vector<1x1x256xf32> to vector<1x256xf32>
    %39 = vector.broadcast %38 : vector<1x256xf32> to vector<4x256xf32>
    %40 = arith.mulf %36, %39 : vector<4x256xf32>
    %41 = arith.addf %33, %40 : vector<4x256xf32>
    %cst_17 = arith.constant 0.000000e+00 : f32
    %42 = vector.broadcast %cst_17 : f32 to vector<4x256xf32>
    %43 = arith.maximumf %40, %42 : vector<4x256xf32>
    %c241_i32 = arith.constant 241 : i32
    %44 = tpu.dynamic_rotate %1 by %c241_i32 dim 1 : vector<4x256xf32>, i32 -> vector<4x256xf32>
    %c6 = arith.constant 6 : index
    %c0_18 = arith.constant 0 : index
    %c0_19 = arith.constant 0 : index
    %45 = vector.load %arg6[%c6, %c0_18, %c0_19] : memref<9x1x256xf32, #tpu.memory_space<vmem>>, vector<1x1x256xf32>
    %46 = vector.shape_cast %45 : vector<1x1x256xf32> to vector<1x256xf32>
    %47 = vector.broadcast %46 : vector<1x256xf32> to vector<4x256xf32>
    %48 = arith.mulf %44, %47 : vector<4x256xf32>
    %49 = arith.addf %41, %48 : vector<4x256xf32>
    %cst_20 = arith.constant 0.000000e+00 : f32
    %50 = vector.broadcast %cst_20 : f32 to vector<4x256xf32>
    %51 = arith.maximumf %48, %50 : vector<4x256xf32>
    %c240_i32 = arith.constant 240 : i32
    %52 = tpu.dynamic_rotate %1 by %c240_i32 dim 1 : vector<4x256xf32>, i32 -> vector<4x256xf32>
    %c7 = arith.constant 7 : index
    %c0_21 = arith.constant 0 : index
    %c0_22 = arith.constant 0 : index
    %53 = vector.load %arg6[%c7, %c0_21, %c0_22] : memref<9x1x256xf32, #tpu.memory_space<vmem>>, vector<1x1x256xf32>
    %54 = vector.shape_cast %53 : vector<1x1x256xf32> to vector<1x256xf32>
    %55 = vector.broadcast %54 : vector<1x256xf32> to vector<4x256xf32>
    %56 = arith.mulf %52, %55 : vector<4x256xf32>
    %57 = arith.addf %49, %56 : vector<4x256xf32>
    %cst_23 = arith.constant 0.000000e+00 : f32
    %58 = vector.broadcast %cst_23 : f32 to vector<4x256xf32>
    %59 = arith.maximumf %56, %58 : vector<4x256xf32>
    %c239_i32 = arith.constant 239 : i32
    %60 = tpu.dynamic_rotate %1 by %c239_i32 dim 1 : vector<4x256xf32>, i32 -> vector<4x256xf32>
    %c8 = arith.constant 8 : index
    %c0_24 = arith.constant 0 : index
    %c0_25 = arith.constant 0 : index
    %61 = vector.load %arg6[%c8, %c0_24, %c0_25] : memref<9x1x256xf32, #tpu.memory_space<vmem>>, vector<1x1x256xf32>
    %62 = vector.shape_cast %61 : vector<1x1x256xf32> to vector<1x256xf32>
    %63 = vector.broadcast %62 : vector<1x256xf32> to vector<4x256xf32>
    %64 = arith.mulf %60, %63 : vector<4x256xf32>
    %65 = arith.addf %57, %64 : vector<4x256xf32>
    %cst_26 = arith.constant 0.000000e+00 : f32
    %66 = vector.broadcast %cst_26 : f32 to vector<4x256xf32>
    %67 = arith.maximumf %64, %66 : vector<4x256xf32>
    %c0_27 = arith.constant 0 : index
    %68 = memref.load %arg1[%c0_27] : memref<6xf32, #tpu.memory_space<smem>>
    %69 = vector.broadcast %68 : f32 to vector<4x256xf32>
    %70 = arith.mulf %69, %1 : vector<4x256xf32>
    %c0_28 = arith.constant 0 : index
    %c0_29 = arith.constant 0 : index
    %c0_30 = arith.constant 0 : index
    %71 = vector.load %arg5[%c0_28, %c0_29, %c0_30] : memref<6x1x256xf32, #tpu.memory_space<vmem>>, vector<1x1x256xf32>
    %72 = vector.shape_cast %71 : vector<1x1x256xf32> to vector<1x256xf32>
    %73 = vector.broadcast %72 : vector<1x256xf32> to vector<4x256xf32>
    %74 = arith.mulf %65, %73 : vector<4x256xf32>
    %75 = arith.addf %70, %74 : vector<4x256xf32>
    %c0_31 = arith.constant 0 : index
    %c0_32 = arith.constant 0 : index
    %c0_33 = arith.constant 0 : index
    %76 = vector.load %arg4[%c0_31, %c0_32, %c0_33] : memref<6x4x1xf32, #tpu.memory_space<vmem>>, vector<1x4x1xf32>
    %77 = vector.shape_cast %76 : vector<1x4x1xf32> to vector<4x1xf32>
    %78 = vector.broadcast %77 : vector<4x1xf32> to vector<4x256xf32>
    %79 = arith.addf %75, %78 : vector<4x256xf32>
    %c0_34 = arith.constant 0 : index
    %c0_35 = arith.constant 0 : index
    %c0_36 = arith.constant 0 : index
    %c0_37 = arith.constant 0 : index
    %80 = vector.load %arg3[%c0_34, %c0_35, %c0_36, %c0_37] : memref<6x9x4x4xf32, #tpu.memory_space<vmem>>, vector<1x1x4x4xf32>
    %81 = vector.shape_cast %80 : vector<1x1x4x4xf32> to vector<4x4xf32>
    %cst_38 = arith.constant dense<0.000000e+00> : vector<4x256xf32>
    %82 = tpu.matmul %81, %8, %cst_38 {dimension_numbers = #tpu.dot_dimension_numbers<[1], [0], [0], [1], [0, 0, 1, 1], [], []>} : vector<4x4xf32>, vector<4x256xf32>, vector<4x256xf32> -> vector<4x256xf32>
    %83 = arith.addf %79, %82 : vector<4x256xf32>
    %c0_39 = arith.constant 0 : index
    %c1_40 = arith.constant 1 : index
    %c0_41 = arith.constant 0 : index
    %c0_42 = arith.constant 0 : index
    %84 = vector.load %arg3[%c0_39, %c1_40, %c0_41, %c0_42] : memref<6x9x4x4xf32, #tpu.memory_space<vmem>>, vector<1x1x4x4xf32>
    %85 = vector.shape_cast %84 : vector<1x1x4x4xf32> to vector<4x4xf32>
    %cst_43 = arith.constant dense<0.000000e+00> : vector<4x256xf32>
    %86 = tpu.matmul %85, %16, %cst_43 {dimension_numbers = #tpu.dot_dimension_numbers<[1], [0], [0], [1], [0, 0, 1, 1], [], []>} : vector<4x4xf32>, vector<4x256xf32>, vector<4x256xf32> -> vector<4x256xf32>
    %87 = arith.addf %83, %86 : vector<4x256xf32>
    %c0_44 = arith.constant 0 : index
    %c2_45 = arith.constant 2 : index
    %c0_46 = arith.constant 0 : index
    %c0_47 = arith.constant 0 : index
    %88 = vector.load %arg3[%c0_44, %c2_45, %c0_46, %c0_47] : memref<6x9x4x4xf32, #tpu.memory_space<vmem>>, vector<1x1x4x4xf32>
    %89 = vector.shape_cast %88 : vector<1x1x4x4xf32> to vector<4x4xf32>
    %cst_48 = arith.constant dense<0.000000e+00> : vector<4x256xf32>
    %90 = tpu.matmul %89, %24, %cst_48 {dimension_numbers = #tpu.dot_dimension_numbers<[1], [0], [0], [1], [0, 0, 1, 1], [], []>} : vector<4x4xf32>, vector<4x256xf32>, vector<4x256xf32> -> vector<4x256xf32>
    %91 = arith.addf %87, %90 : vector<4x256xf32>
    %c0_49 = arith.constant 0 : index
    %c3_50 = arith.constant 3 : index
    %c0_51 = arith.constant 0 : index
    %c0_52 = arith.constant 0 : index
    %92 = vector.load %arg3[%c0_49, %c3_50, %c0_51, %c0_52] : memref<6x9x4x4xf32, #tpu.memory_space<vmem>>, vector<1x1x4x4xf32>
    %93 = vector.shape_cast %92 : vector<1x1x4x4xf32> to vector<4x4xf32>
    %cst_53 = arith.constant dense<0.000000e+00> : vector<4x256xf32>
    %94 = tpu.matmul %93, %32, %cst_53 {dimension_numbers = #tpu.dot_dimension_numbers<[1], [0], [0], [1], [0, 0, 1, 1], [], []>} : vector<4x4xf32>, vector<4x256xf32>, vector<4x256xf32> -> vector<4x256xf32>
    %95 = arith.addf %91, %94 : vector<4x256xf32>
    %c0_54 = arith.constant 0 : index
    %c4 = arith.constant 4 : index
    %c0_55 = arith.constant 0 : index
    %c0_56 = arith.constant 0 : index
    %96 = vector.load %arg3[%c0_54, %c4, %c0_55, %c0_56] : memref<6x9x4x4xf32, #tpu.memory_space<vmem>>, vector<1x1x4x4xf32>
    %97 = vector.shape_cast %96 : vector<1x1x4x4xf32> to vector<4x4xf32>
    %cst_57 = arith.constant dense<0.000000e+00> : vector<4x256xf32>
    %98 = tpu.matmul %97, %35, %cst_57 {dimension_numbers = #tpu.dot_dimension_numbers<[1], [0], [0], [1], [0, 0, 1, 1], [], []>} : vector<4x4xf32>, vector<4x256xf32>, vector<4x256xf32> -> vector<4x256xf32>
    %99 = arith.addf %95, %98 : vector<4x256xf32>
    %c0_58 = arith.constant 0 : index
    %c5_59 = arith.constant 5 : index
    %c0_60 = arith.constant 0 : index
    %c0_61 = arith.constant 0 : index
    %100 = vector.load %arg3[%c0_58, %c5_59, %c0_60, %c0_61] : memref<6x9x4x4xf32, #tpu.memory_space<vmem>>, vector<1x1x4x4xf32>
    %101 = vector.shape_cast %100 : vector<1x1x4x4xf32> to vector<4x4xf32>
    %cst_62 = arith.constant dense<0.000000e+00> : vector<4x256xf32>
    %102 = tpu.matmul %101, %43, %cst_62 {dimension_numbers = #tpu.dot_dimension_numbers<[1], [0], [0], [1], [0, 0, 1, 1], [], []>} : vector<4x4xf32>, vector<4x256xf32>, vector<4x256xf32> -> vector<4x256xf32>
    %103 = arith.addf %99, %102 : vector<4x256xf32>
    %c0_63 = arith.constant 0 : index
    %c6_64 = arith.constant 6 : index
    %c0_65 = arith.constant 0 : index
    %c0_66 = arith.constant 0 : index
    %104 = vector.load %arg3[%c0_63, %c6_64, %c0_65, %c0_66] : memref<6x9x4x4xf32, #tpu.memory_space<vmem>>, vector<1x1x4x4xf32>
    %105 = vector.shape_cast %104 : vector<1x1x4x4xf32> to vector<4x4xf32>
    %cst_67 = arith.constant dense<0.000000e+00> : vector<4x256xf32>
    %106 = tpu.matmul %105, %51, %cst_67 {dimension_numbers = #tpu.dot_dimension_numbers<[1], [0], [0], [1], [0, 0, 1, 1], [], []>} : vector<4x4xf32>, vector<4x256xf32>, vector<4x256xf32> -> vector<4x256xf32>
    %107 = arith.addf %103, %106 : vector<4x256xf32>
    %c0_68 = arith.constant 0 : index
    %c7_69 = arith.constant 7 : index
    %c0_70 = arith.constant 0 : index
    %c0_71 = arith.constant 0 : index
    %108 = vector.load %arg3[%c0_68, %c7_69, %c0_70, %c0_71] : memref<6x9x4x4xf32, #tpu.memory_space<vmem>>, vector<1x1x4x4xf32>
    %109 = vector.shape_cast %108 : vector<1x1x4x4xf32> to vector<4x4xf32>
    %cst_72 = arith.constant dense<0.000000e+00> : vector<4x256xf32>
    %110 = tpu.matmul %109, %59, %cst_72 {dimension_numbers = #tpu.dot_dimension_numbers<[1], [0], [0], [1], [0, 0, 1, 1], [], []>} : vector<4x4xf32>, vector<4x256xf32>, vector<4x256xf32> -> vector<4x256xf32>
    %111 = arith.addf %107, %110 : vector<4x256xf32>
    %c0_73 = arith.constant 0 : index
    %c8_74 = arith.constant 8 : index
    %c0_75 = arith.constant 0 : index
    %c0_76 = arith.constant 0 : index
    %112 = vector.load %arg3[%c0_73, %c8_74, %c0_75, %c0_76] : memref<6x9x4x4xf32, #tpu.memory_space<vmem>>, vector<1x1x4x4xf32>
    %113 = vector.shape_cast %112 : vector<1x1x4x4xf32> to vector<4x4xf32>
    %cst_77 = arith.constant dense<0.000000e+00> : vector<4x256xf32>
    %114 = tpu.matmul %113, %67, %cst_77 {dimension_numbers = #tpu.dot_dimension_numbers<[1], [0], [0], [1], [0, 0, 1, 1], [], []>} : vector<4x4xf32>, vector<4x256xf32>, vector<4x256xf32> -> vector<4x256xf32>
    %115 = arith.addf %111, %114 : vector<4x256xf32>
    %c1_78 = arith.constant 1 : index
    %116 = memref.load %arg1[%c1_78] : memref<6xf32, #tpu.memory_space<smem>>
    %117 = vector.broadcast %116 : f32 to vector<4x256xf32>
    %118 = arith.mulf %117, %1 : vector<4x256xf32>
    %c1_79 = arith.constant 1 : index
    %c0_80 = arith.constant 0 : index
    %c0_81 = arith.constant 0 : index
    %119 = vector.load %arg5[%c1_79, %c0_80, %c0_81] : memref<6x1x256xf32, #tpu.memory_space<vmem>>, vector<1x1x256xf32>
    %120 = vector.shape_cast %119 : vector<1x1x256xf32> to vector<1x256xf32>
    %121 = vector.broadcast %120 : vector<1x256xf32> to vector<4x256xf32>
    %122 = arith.mulf %65, %121 : vector<4x256xf32>
    %123 = arith.addf %118, %122 : vector<4x256xf32>
    %c1_82 = arith.constant 1 : index
    %c0_83 = arith.constant 0 : index
    %c0_84 = arith.constant 0 : index
    %124 = vector.load %arg4[%c1_82, %c0_83, %c0_84] : memref<6x4x1xf32, #tpu.memory_space<vmem>>, vector<1x4x1xf32>
    %125 = vector.shape_cast %124 : vector<1x4x1xf32> to vector<4x1xf32>
    %126 = vector.broadcast %125 : vector<4x1xf32> to vector<4x256xf32>
    %127 = arith.addf %123, %126 : vector<4x256xf32>
    %c1_85 = arith.constant 1 : index
    %c0_86 = arith.constant 0 : index
    %c0_87 = arith.constant 0 : index
    %c0_88 = arith.constant 0 : index
    %128 = vector.load %arg3[%c1_85, %c0_86, %c0_87, %c0_88] : memref<6x9x4x4xf32, #tpu.memory_space<vmem>>, vector<1x1x4x4xf32>
    %129 = vector.shape_cast %128 : vector<1x1x4x4xf32> to vector<4x4xf32>
    %cst_89 = arith.constant dense<0.000000e+00> : vector<4x256xf32>
    %130 = tpu.matmul %129, %8, %cst_89 {dimension_numbers = #tpu.dot_dimension_numbers<[1], [0], [0], [1], [0, 0, 1, 1], [], []>} : vector<4x4xf32>, vector<4x256xf32>, vector<4x256xf32> -> vector<4x256xf32>
    %131 = arith.addf %127, %130 : vector<4x256xf32>
    %c1_90 = arith.constant 1 : index
    %c1_91 = arith.constant 1 : index
    %c0_92 = arith.constant 0 : index
    %c0_93 = arith.constant 0 : index
    %132 = vector.load %arg3[%c1_90, %c1_91, %c0_92, %c0_93] : memref<6x9x4x4xf32, #tpu.memory_space<vmem>>, vector<1x1x4x4xf32>
    %133 = vector.shape_cast %132 : vector<1x1x4x4xf32> to vector<4x4xf32>
    %cst_94 = arith.constant dense<0.000000e+00> : vector<4x256xf32>
    %134 = tpu.matmul %133, %16, %cst_94 {dimension_numbers = #tpu.dot_dimension_numbers<[1], [0], [0], [1], [0, 0, 1, 1], [], []>} : vector<4x4xf32>, vector<4x256xf32>, vector<4x256xf32> -> vector<4x256xf32>
    %135 = arith.addf %131, %134 : vector<4x256xf32>
    %c1_95 = arith.constant 1 : index
    %c2_96 = arith.constant 2 : index
    %c0_97 = arith.constant 0 : index
    %c0_98 = arith.constant 0 : index
    %136 = vector.load %arg3[%c1_95, %c2_96, %c0_97, %c0_98] : memref<6x9x4x4xf32, #tpu.memory_space<vmem>>, vector<1x1x4x4xf32>
    %137 = vector.shape_cast %136 : vector<1x1x4x4xf32> to vector<4x4xf32>
    %cst_99 = arith.constant dense<0.000000e+00> : vector<4x256xf32>
    %138 = tpu.matmul %137, %24, %cst_99 {dimension_numbers = #tpu.dot_dimension_numbers<[1], [0], [0], [1], [0, 0, 1, 1], [], []>} : vector<4x4xf32>, vector<4x256xf32>, vector<4x256xf32> -> vector<4x256xf32>
    %139 = arith.addf %135, %138 : vector<4x256xf32>
    %c1_100 = arith.constant 1 : index
    %c3_101 = arith.constant 3 : index
    %c0_102 = arith.constant 0 : index
    %c0_103 = arith.constant 0 : index
    %140 = vector.load %arg3[%c1_100, %c3_101, %c0_102, %c0_103] : memref<6x9x4x4xf32, #tpu.memory_space<vmem>>, vector<1x1x4x4xf32>
    %141 = vector.shape_cast %140 : vector<1x1x4x4xf32> to vector<4x4xf32>
    %cst_104 = arith.constant dense<0.000000e+00> : vector<4x256xf32>
    %142 = tpu.matmul %141, %32, %cst_104 {dimension_numbers = #tpu.dot_dimension_numbers<[1], [0], [0], [1], [0, 0, 1, 1], [], []>} : vector<4x4xf32>, vector<4x256xf32>, vector<4x256xf32> -> vector<4x256xf32>
    %143 = arith.addf %139, %142 : vector<4x256xf32>
    %c1_105 = arith.constant 1 : index
    %c4_106 = arith.constant 4 : index
    %c0_107 = arith.constant 0 : index
    %c0_108 = arith.constant 0 : index
    %144 = vector.load %arg3[%c1_105, %c4_106, %c0_107, %c0_108] : memref<6x9x4x4xf32, #tpu.memory_space<vmem>>, vector<1x1x4x4xf32>
    %145 = vector.shape_cast %144 : vector<1x1x4x4xf32> to vector<4x4xf32>
    %cst_109 = arith.constant dense<0.000000e+00> : vector<4x256xf32>
    %146 = tpu.matmul %145, %35, %cst_109 {dimension_numbers = #tpu.dot_dimension_numbers<[1], [0], [0], [1], [0, 0, 1, 1], [], []>} : vector<4x4xf32>, vector<4x256xf32>, vector<4x256xf32> -> vector<4x256xf32>
    %147 = arith.addf %143, %146 : vector<4x256xf32>
    %c1_110 = arith.constant 1 : index
    %c5_111 = arith.constant 5 : index
    %c0_112 = arith.constant 0 : index
    %c0_113 = arith.constant 0 : index
    %148 = vector.load %arg3[%c1_110, %c5_111, %c0_112, %c0_113] : memref<6x9x4x4xf32, #tpu.memory_space<vmem>>, vector<1x1x4x4xf32>
    %149 = vector.shape_cast %148 : vector<1x1x4x4xf32> to vector<4x4xf32>
    %cst_114 = arith.constant dense<0.000000e+00> : vector<4x256xf32>
    %150 = tpu.matmul %149, %43, %cst_114 {dimension_numbers = #tpu.dot_dimension_numbers<[1], [0], [0], [1], [0, 0, 1, 1], [], []>} : vector<4x4xf32>, vector<4x256xf32>, vector<4x256xf32> -> vector<4x256xf32>
    %151 = arith.addf %147, %150 : vector<4x256xf32>
    %c1_115 = arith.constant 1 : index
    %c6_116 = arith.constant 6 : index
    %c0_117 = arith.constant 0 : index
    %c0_118 = arith.constant 0 : index
    %152 = vector.load %arg3[%c1_115, %c6_116, %c0_117, %c0_118] : memref<6x9x4x4xf32, #tpu.memory_space<vmem>>, vector<1x1x4x4xf32>
    %153 = vector.shape_cast %152 : vector<1x1x4x4xf32> to vector<4x4xf32>
    %cst_119 = arith.constant dense<0.000000e+00> : vector<4x256xf32>
    %154 = tpu.matmul %153, %51, %cst_119 {dimension_numbers = #tpu.dot_dimension_numbers<[1], [0], [0], [1], [0, 0, 1, 1], [], []>} : vector<4x4xf32>, vector<4x256xf32>, vector<4x256xf32> -> vector<4x256xf32>
    %155 = arith.addf %151, %154 : vector<4x256xf32>
    %c1_120 = arith.constant 1 : index
    %c7_121 = arith.constant 7 : index
    %c0_122 = arith.constant 0 : index
    %c0_123 = arith.constant 0 : index
    %156 = vector.load %arg3[%c1_120, %c7_121, %c0_122, %c0_123] : memref<6x9x4x4xf32, #tpu.memory_space<vmem>>, vector<1x1x4x4xf32>
    %157 = vector.shape_cast %156 : vector<1x1x4x4xf32> to vector<4x4xf32>
    %cst_124 = arith.constant dense<0.000000e+00> : vector<4x256xf32>
    %158 = tpu.matmul %157, %59, %cst_124 {dimension_numbers = #tpu.dot_dimension_numbers<[1], [0], [0], [1], [0, 0, 1, 1], [], []>} : vector<4x4xf32>, vector<4x256xf32>, vector<4x256xf32> -> vector<4x256xf32>
    %159 = arith.addf %155, %158 : vector<4x256xf32>
    %c1_125 = arith.constant 1 : index
    %c8_126 = arith.constant 8 : index
    %c0_127 = arith.constant 0 : index
    %c0_128 = arith.constant 0 : index
    %160 = vector.load %arg3[%c1_125, %c8_126, %c0_127, %c0_128] : memref<6x9x4x4xf32, #tpu.memory_space<vmem>>, vector<1x1x4x4xf32>
    %161 = vector.shape_cast %160 : vector<1x1x4x4xf32> to vector<4x4xf32>
    %cst_129 = arith.constant dense<0.000000e+00> : vector<4x256xf32>
    %162 = tpu.matmul %161, %67, %cst_129 {dimension_numbers = #tpu.dot_dimension_numbers<[1], [0], [0], [1], [0, 0, 1, 1], [], []>} : vector<4x4xf32>, vector<4x256xf32>, vector<4x256xf32> -> vector<4x256xf32>
    %163 = arith.addf %159, %162 : vector<4x256xf32>
    %c3_130 = arith.constant 3 : index
    %164 = memref.load %arg1[%c3_130] : memref<6xf32, #tpu.memory_space<smem>>
    %165 = vector.broadcast %164 : f32 to vector<4x256xf32>
    %166 = arith.mulf %165, %1 : vector<4x256xf32>
    %c3_131 = arith.constant 3 : index
    %c0_132 = arith.constant 0 : index
    %c0_133 = arith.constant 0 : index
    %167 = vector.load %arg5[%c3_131, %c0_132, %c0_133] : memref<6x1x256xf32, #tpu.memory_space<vmem>>, vector<1x1x256xf32>
    %168 = vector.shape_cast %167 : vector<1x1x256xf32> to vector<1x256xf32>
    %169 = vector.broadcast %168 : vector<1x256xf32> to vector<4x256xf32>
    %170 = arith.mulf %65, %169 : vector<4x256xf32>
    %171 = arith.addf %166, %170 : vector<4x256xf32>
    %c3_134 = arith.constant 3 : index
    %c0_135 = arith.constant 0 : index
    %c0_136 = arith.constant 0 : index
    %172 = vector.load %arg4[%c3_134, %c0_135, %c0_136] : memref<6x4x1xf32, #tpu.memory_space<vmem>>, vector<1x4x1xf32>
    %173 = vector.shape_cast %172 : vector<1x4x1xf32> to vector<4x1xf32>
    %174 = vector.broadcast %173 : vector<4x1xf32> to vector<4x256xf32>
    %175 = arith.addf %171, %174 : vector<4x256xf32>
    %c3_137 = arith.constant 3 : index
    %c0_138 = arith.constant 0 : index
    %c0_139 = arith.constant 0 : index
    %c0_140 = arith.constant 0 : index
    %176 = vector.load %arg3[%c3_137, %c0_138, %c0_139, %c0_140] : memref<6x9x4x4xf32, #tpu.memory_space<vmem>>, vector<1x1x4x4xf32>
    %177 = vector.shape_cast %176 : vector<1x1x4x4xf32> to vector<4x4xf32>
    %cst_141 = arith.constant dense<0.000000e+00> : vector<4x256xf32>
    %178 = tpu.matmul %177, %8, %cst_141 {dimension_numbers = #tpu.dot_dimension_numbers<[1], [0], [0], [1], [0, 0, 1, 1], [], []>} : vector<4x4xf32>, vector<4x256xf32>, vector<4x256xf32> -> vector<4x256xf32>
    %179 = arith.addf %175, %178 : vector<4x256xf32>
    %c3_142 = arith.constant 3 : index
    %c1_143 = arith.constant 1 : index
    %c0_144 = arith.constant 0 : index
    %c0_145 = arith.constant 0 : index
    %180 = vector.load %arg3[%c3_142, %c1_143, %c0_144, %c0_145] : memref<6x9x4x4xf32, #tpu.memory_space<vmem>>, vector<1x1x4x4xf32>
    %181 = vector.shape_cast %180 : vector<1x1x4x4xf32> to vector<4x4xf32>
    %cst_146 = arith.constant dense<0.000000e+00> : vector<4x256xf32>
    %182 = tpu.matmul %181, %16, %cst_146 {dimension_numbers = #tpu.dot_dimension_numbers<[1], [0], [0], [1], [0, 0, 1, 1], [], []>} : vector<4x4xf32>, vector<4x256xf32>, vector<4x256xf32> -> vector<4x256xf32>
    %183 = arith.addf %179, %182 : vector<4x256xf32>
    %c3_147 = arith.constant 3 : index
    %c2_148 = arith.constant 2 : index
    %c0_149 = arith.constant 0 : index
    %c0_150 = arith.constant 0 : index
    %184 = vector.load %arg3[%c3_147, %c2_148, %c0_149, %c0_150] : memref<6x9x4x4xf32, #tpu.memory_space<vmem>>, vector<1x1x4x4xf32>
    %185 = vector.shape_cast %184 : vector<1x1x4x4xf32> to vector<4x4xf32>
    %cst_151 = arith.constant dense<0.000000e+00> : vector<4x256xf32>
    %186 = tpu.matmul %185, %24, %cst_151 {dimension_numbers = #tpu.dot_dimension_numbers<[1], [0], [0], [1], [0, 0, 1, 1], [], []>} : vector<4x4xf32>, vector<4x256xf32>, vector<4x256xf32> -> vector<4x256xf32>
    %187 = arith.addf %183, %186 : vector<4x256xf32>
    %c3_152 = arith.constant 3 : index
    %c3_153 = arith.constant 3 : index
    %c0_154 = arith.constant 0 : index
    %c0_155 = arith.constant 0 : index
    %188 = vector.load %arg3[%c3_152, %c3_153, %c0_154, %c0_155] : memref<6x9x4x4xf32, #tpu.memory_space<vmem>>, vector<1x1x4x4xf32>
    %189 = vector.shape_cast %188 : vector<1x1x4x4xf32> to vector<4x4xf32>
    %cst_156 = arith.constant dense<0.000000e+00> : vector<4x256xf32>
    %190 = tpu.matmul %189, %32, %cst_156 {dimension_numbers = #tpu.dot_dimension_numbers<[1], [0], [0], [1], [0, 0, 1, 1], [], []>} : vector<4x4xf32>, vector<4x256xf32>, vector<4x256xf32> -> vector<4x256xf32>
    %191 = arith.addf %187, %190 : vector<4x256xf32>
    %c3_157 = arith.constant 3 : index
    %c4_158 = arith.constant 4 : index
    %c0_159 = arith.constant 0 : index
    %c0_160 = arith.constant 0 : index
    %192 = vector.load %arg3[%c3_157, %c4_158, %c0_159, %c0_160] : memref<6x9x4x4xf32, #tpu.memory_space<vmem>>, vector<1x1x4x4xf32>
    %193 = vector.shape_cast %192 : vector<1x1x4x4xf32> to vector<4x4xf32>
    %cst_161 = arith.constant dense<0.000000e+00> : vector<4x256xf32>
    %194 = tpu.matmul %193, %35, %cst_161 {dimension_numbers = #tpu.dot_dimension_numbers<[1], [0], [0], [1], [0, 0, 1, 1], [], []>} : vector<4x4xf32>, vector<4x256xf32>, vector<4x256xf32> -> vector<4x256xf32>
    %195 = arith.addf %191, %194 : vector<4x256xf32>
    %c3_162 = arith.constant 3 : index
    %c5_163 = arith.constant 5 : index
    %c0_164 = arith.constant 0 : index
    %c0_165 = arith.constant 0 : index
    %196 = vector.load %arg3[%c3_162, %c5_163, %c0_164, %c0_165] : memref<6x9x4x4xf32, #tpu.memory_space<vmem>>, vector<1x1x4x4xf32>
    %197 = vector.shape_cast %196 : vector<1x1x4x4xf32> to vector<4x4xf32>
    %cst_166 = arith.constant dense<0.000000e+00> : vector<4x256xf32>
    %198 = tpu.matmul %197, %43, %cst_166 {dimension_numbers = #tpu.dot_dimension_numbers<[1], [0], [0], [1], [0, 0, 1, 1], [], []>} : vector<4x4xf32>, vector<4x256xf32>, vector<4x256xf32> -> vector<4x256xf32>
    %199 = arith.addf %195, %198 : vector<4x256xf32>
    %c3_167 = arith.constant 3 : index
    %c6_168 = arith.constant 6 : index
    %c0_169 = arith.constant 0 : index
    %c0_170 = arith.constant 0 : index
    %200 = vector.load %arg3[%c3_167, %c6_168, %c0_169, %c0_170] : memref<6x9x4x4xf32, #tpu.memory_space<vmem>>, vector<1x1x4x4xf32>
    %201 = vector.shape_cast %200 : vector<1x1x4x4xf32> to vector<4x4xf32>
    %cst_171 = arith.constant dense<0.000000e+00> : vector<4x256xf32>
    %202 = tpu.matmul %201, %51, %cst_171 {dimension_numbers = #tpu.dot_dimension_numbers<[1], [0], [0], [1], [0, 0, 1, 1], [], []>} : vector<4x4xf32>, vector<4x256xf32>, vector<4x256xf32> -> vector<4x256xf32>
    %203 = arith.addf %199, %202 : vector<4x256xf32>
    %c3_172 = arith.constant 3 : index
    %c7_173 = arith.constant 7 : index
    %c0_174 = arith.constant 0 : index
    %c0_175 = arith.constant 0 : index
    %204 = vector.load %arg3[%c3_172, %c7_173, %c0_174, %c0_175] : memref<6x9x4x4xf32, #tpu.memory_space<vmem>>, vector<1x1x4x4xf32>
    %205 = vector.shape_cast %204 : vector<1x1x4x4xf32> to vector<4x4xf32>
    %cst_176 = arith.constant dense<0.000000e+00> : vector<4x256xf32>
    %206 = tpu.matmul %205, %59, %cst_176 {dimension_numbers = #tpu.dot_dimension_numbers<[1], [0], [0], [1], [0, 0, 1, 1], [], []>} : vector<4x4xf32>, vector<4x256xf32>, vector<4x256xf32> -> vector<4x256xf32>
    %207 = arith.addf %203, %206 : vector<4x256xf32>
    %c3_177 = arith.constant 3 : index
    %c8_178 = arith.constant 8 : index
    %c0_179 = arith.constant 0 : index
    %c0_180 = arith.constant 0 : index
    %208 = vector.load %arg3[%c3_177, %c8_178, %c0_179, %c0_180] : memref<6x9x4x4xf32, #tpu.memory_space<vmem>>, vector<1x1x4x4xf32>
    %209 = vector.shape_cast %208 : vector<1x1x4x4xf32> to vector<4x4xf32>
    %cst_181 = arith.constant dense<0.000000e+00> : vector<4x256xf32>
    %210 = tpu.matmul %209, %67, %cst_181 {dimension_numbers = #tpu.dot_dimension_numbers<[1], [0], [0], [1], [0, 0, 1, 1], [], []>} : vector<4x4xf32>, vector<4x256xf32>, vector<4x256xf32> -> vector<4x256xf32>
    %211 = arith.addf %207, %210 : vector<4x256xf32>
    %c17_i32_182 = arith.constant 17 : i32
    %212 = tpu.dynamic_rotate %115 by %c17_i32_182 dim 1 : vector<4x256xf32>, i32 -> vector<4x256xf32>
    %c0_183 = arith.constant 0 : index
    %c0_184 = arith.constant 0 : index
    %c0_185 = arith.constant 0 : index
    %213 = vector.load %arg6[%c0_183, %c0_184, %c0_185] : memref<9x1x256xf32, #tpu.memory_space<vmem>>, vector<1x1x256xf32>
    %214 = vector.shape_cast %213 : vector<1x1x256xf32> to vector<1x256xf32>
    %215 = vector.broadcast %214 : vector<1x256xf32> to vector<4x256xf32>
    %216 = arith.mulf %212, %215 : vector<4x256xf32>
    %cst_186 = arith.constant 0.000000e+00 : f32
    %217 = vector.broadcast %cst_186 : f32 to vector<4x256xf32>
    %218 = arith.maximumf %216, %217 : vector<4x256xf32>
    %c16_i32_187 = arith.constant 16 : i32
    %219 = tpu.dynamic_rotate %115 by %c16_i32_187 dim 1 : vector<4x256xf32>, i32 -> vector<4x256xf32>
    %c1_188 = arith.constant 1 : index
    %c0_189 = arith.constant 0 : index
    %c0_190 = arith.constant 0 : index
    %220 = vector.load %arg6[%c1_188, %c0_189, %c0_190] : memref<9x1x256xf32, #tpu.memory_space<vmem>>, vector<1x1x256xf32>
    %221 = vector.shape_cast %220 : vector<1x1x256xf32> to vector<1x256xf32>
    %222 = vector.broadcast %221 : vector<1x256xf32> to vector<4x256xf32>
    %223 = arith.mulf %219, %222 : vector<4x256xf32>
    %224 = arith.addf %216, %223 : vector<4x256xf32>
    %cst_191 = arith.constant 0.000000e+00 : f32
    %225 = vector.broadcast %cst_191 : f32 to vector<4x256xf32>
    %226 = arith.maximumf %223, %225 : vector<4x256xf32>
    %c15_i32_192 = arith.constant 15 : i32
    %227 = tpu.dynamic_rotate %115 by %c15_i32_192 dim 1 : vector<4x256xf32>, i32 -> vector<4x256xf32>
    %c2_193 = arith.constant 2 : index
    %c0_194 = arith.constant 0 : index
    %c0_195 = arith.constant 0 : index
    %228 = vector.load %arg6[%c2_193, %c0_194, %c0_195] : memref<9x1x256xf32, #tpu.memory_space<vmem>>, vector<1x1x256xf32>
    %229 = vector.shape_cast %228 : vector<1x1x256xf32> to vector<1x256xf32>
    %230 = vector.broadcast %229 : vector<1x256xf32> to vector<4x256xf32>
    %231 = arith.mulf %227, %230 : vector<4x256xf32>
    %232 = arith.addf %224, %231 : vector<4x256xf32>
    %cst_196 = arith.constant 0.000000e+00 : f32
    %233 = vector.broadcast %cst_196 : f32 to vector<4x256xf32>
    %234 = arith.maximumf %231, %233 : vector<4x256xf32>
    %c1_i32_197 = arith.constant 1 : i32
    %235 = tpu.dynamic_rotate %115 by %c1_i32_197 dim 1 : vector<4x256xf32>, i32 -> vector<4x256xf32>
    %c3_198 = arith.constant 3 : index
    %c0_199 = arith.constant 0 : index
    %c0_200 = arith.constant 0 : index
    %236 = vector.load %arg6[%c3_198, %c0_199, %c0_200] : memref<9x1x256xf32, #tpu.memory_space<vmem>>, vector<1x1x256xf32>
    %237 = vector.shape_cast %236 : vector<1x1x256xf32> to vector<1x256xf32>
    %238 = vector.broadcast %237 : vector<1x256xf32> to vector<4x256xf32>
    %239 = arith.mulf %235, %238 : vector<4x256xf32>
    %240 = arith.addf %232, %239 : vector<4x256xf32>
    %cst_201 = arith.constant 0.000000e+00 : f32
    %241 = vector.broadcast %cst_201 : f32 to vector<4x256xf32>
    %242 = arith.maximumf %239, %241 : vector<4x256xf32>
    %243 = arith.addf %240, %115 : vector<4x256xf32>
    %cst_202 = arith.constant 0.000000e+00 : f32
    %244 = vector.broadcast %cst_202 : f32 to vector<4x256xf32>
    %245 = arith.maximumf %115, %244 : vector<4x256xf32>
    %c255_i32_203 = arith.constant 255 : i32
    %246 = tpu.dynamic_rotate %115 by %c255_i32_203 dim 1 : vector<4x256xf32>, i32 -> vector<4x256xf32>
    %c5_204 = arith.constant 5 : index
    %c0_205 = arith.constant 0 : index
    %c0_206 = arith.constant 0 : index
    %247 = vector.load %arg6[%c5_204, %c0_205, %c0_206] : memref<9x1x256xf32, #tpu.memory_space<vmem>>, vector<1x1x256xf32>
    %248 = vector.shape_cast %247 : vector<1x1x256xf32> to vector<1x256xf32>
    %249 = vector.broadcast %248 : vector<1x256xf32> to vector<4x256xf32>
    %250 = arith.mulf %246, %249 : vector<4x256xf32>
    %251 = arith.addf %243, %250 : vector<4x256xf32>
    %cst_207 = arith.constant 0.000000e+00 : f32
    %252 = vector.broadcast %cst_207 : f32 to vector<4x256xf32>
    %253 = arith.maximumf %250, %252 : vector<4x256xf32>
    %c241_i32_208 = arith.constant 241 : i32
    %254 = tpu.dynamic_rotate %115 by %c241_i32_208 dim 1 : vector<4x256xf32>, i32 -> vector<4x256xf32>
    %c6_209 = arith.constant 6 : index
    %c0_210 = arith.constant 0 : index
    %c0_211 = arith.constant 0 : index
    %255 = vector.load %arg6[%c6_209, %c0_210, %c0_211] : memref<9x1x256xf32, #tpu.memory_space<vmem>>, vector<1x1x256xf32>
    %256 = vector.shape_cast %255 : vector<1x1x256xf32> to vector<1x256xf32>
    %257 = vector.broadcast %256 : vector<1x256xf32> to vector<4x256xf32>
    %258 = arith.mulf %254, %257 : vector<4x256xf32>
    %259 = arith.addf %251, %258 : vector<4x256xf32>
    %cst_212 = arith.constant 0.000000e+00 : f32
    %260 = vector.broadcast %cst_212 : f32 to vector<4x256xf32>
    %261 = arith.maximumf %258, %260 : vector<4x256xf32>
    %c240_i32_213 = arith.constant 240 : i32
    %262 = tpu.dynamic_rotate %115 by %c240_i32_213 dim 1 : vector<4x256xf32>, i32 -> vector<4x256xf32>
    %c7_214 = arith.constant 7 : index
    %c0_215 = arith.constant 0 : index
    %c0_216 = arith.constant 0 : index
    %263 = vector.load %arg6[%c7_214, %c0_215, %c0_216] : memref<9x1x256xf32, #tpu.memory_space<vmem>>, vector<1x1x256xf32>
    %264 = vector.shape_cast %263 : vector<1x1x256xf32> to vector<1x256xf32>
    %265 = vector.broadcast %264 : vector<1x256xf32> to vector<4x256xf32>
    %266 = arith.mulf %262, %265 : vector<4x256xf32>
    %267 = arith.addf %259, %266 : vector<4x256xf32>
    %cst_217 = arith.constant 0.000000e+00 : f32
    %268 = vector.broadcast %cst_217 : f32 to vector<4x256xf32>
    %269 = arith.maximumf %266, %268 : vector<4x256xf32>
    %c239_i32_218 = arith.constant 239 : i32
    %270 = tpu.dynamic_rotate %115 by %c239_i32_218 dim 1 : vector<4x256xf32>, i32 -> vector<4x256xf32>
    %c8_219 = arith.constant 8 : index
    %c0_220 = arith.constant 0 : index
    %c0_221 = arith.constant 0 : index
    %271 = vector.load %arg6[%c8_219, %c0_220, %c0_221] : memref<9x1x256xf32, #tpu.memory_space<vmem>>, vector<1x1x256xf32>
    %272 = vector.shape_cast %271 : vector<1x1x256xf32> to vector<1x256xf32>
    %273 = vector.broadcast %272 : vector<1x256xf32> to vector<4x256xf32>
    %274 = arith.mulf %270, %273 : vector<4x256xf32>
    %275 = arith.addf %267, %274 : vector<4x256xf32>
    %cst_222 = arith.constant 0.000000e+00 : f32
    %276 = vector.broadcast %cst_222 : f32 to vector<4x256xf32>
    %277 = arith.maximumf %274, %276 : vector<4x256xf32>
    %c2_223 = arith.constant 2 : index
    %278 = memref.load %arg1[%c2_223] : memref<6xf32, #tpu.memory_space<smem>>
    %279 = vector.broadcast %278 : f32 to vector<4x256xf32>
    %280 = arith.mulf %279, %115 : vector<4x256xf32>
    %c2_224 = arith.constant 2 : index
    %c0_225 = arith.constant 0 : index
    %c0_226 = arith.constant 0 : index
    %281 = vector.load %arg5[%c2_224, %c0_225, %c0_226] : memref<6x1x256xf32, #tpu.memory_space<vmem>>, vector<1x1x256xf32>
    %282 = vector.shape_cast %281 : vector<1x1x256xf32> to vector<1x256xf32>
    %283 = vector.broadcast %282 : vector<1x256xf32> to vector<4x256xf32>
    %284 = arith.mulf %275, %283 : vector<4x256xf32>
    %285 = arith.addf %280, %284 : vector<4x256xf32>
    %c2_227 = arith.constant 2 : index
    %c0_228 = arith.constant 0 : index
    %c0_229 = arith.constant 0 : index
    %286 = vector.load %arg4[%c2_227, %c0_228, %c0_229] : memref<6x4x1xf32, #tpu.memory_space<vmem>>, vector<1x4x1xf32>
    %287 = vector.shape_cast %286 : vector<1x4x1xf32> to vector<4x1xf32>
    %288 = vector.broadcast %287 : vector<4x1xf32> to vector<4x256xf32>
    %289 = arith.addf %285, %288 : vector<4x256xf32>
    %c2_230 = arith.constant 2 : index
    %c0_231 = arith.constant 0 : index
    %c0_232 = arith.constant 0 : index
    %c0_233 = arith.constant 0 : index
    %290 = vector.load %arg3[%c2_230, %c0_231, %c0_232, %c0_233] : memref<6x9x4x4xf32, #tpu.memory_space<vmem>>, vector<1x1x4x4xf32>
    %291 = vector.shape_cast %290 : vector<1x1x4x4xf32> to vector<4x4xf32>
    %cst_234 = arith.constant dense<0.000000e+00> : vector<4x256xf32>
    %292 = tpu.matmul %291, %218, %cst_234 {dimension_numbers = #tpu.dot_dimension_numbers<[1], [0], [0], [1], [0, 0, 1, 1], [], []>} : vector<4x4xf32>, vector<4x256xf32>, vector<4x256xf32> -> vector<4x256xf32>
    %293 = arith.addf %289, %292 : vector<4x256xf32>
    %c2_235 = arith.constant 2 : index
    %c1_236 = arith.constant 1 : index
    %c0_237 = arith.constant 0 : index
    %c0_238 = arith.constant 0 : index
    %294 = vector.load %arg3[%c2_235, %c1_236, %c0_237, %c0_238] : memref<6x9x4x4xf32, #tpu.memory_space<vmem>>, vector<1x1x4x4xf32>
    %295 = vector.shape_cast %294 : vector<1x1x4x4xf32> to vector<4x4xf32>
    %cst_239 = arith.constant dense<0.000000e+00> : vector<4x256xf32>
    %296 = tpu.matmul %295, %226, %cst_239 {dimension_numbers = #tpu.dot_dimension_numbers<[1], [0], [0], [1], [0, 0, 1, 1], [], []>} : vector<4x4xf32>, vector<4x256xf32>, vector<4x256xf32> -> vector<4x256xf32>
    %297 = arith.addf %293, %296 : vector<4x256xf32>
    %c2_240 = arith.constant 2 : index
    %c2_241 = arith.constant 2 : index
    %c0_242 = arith.constant 0 : index
    %c0_243 = arith.constant 0 : index
    %298 = vector.load %arg3[%c2_240, %c2_241, %c0_242, %c0_243] : memref<6x9x4x4xf32, #tpu.memory_space<vmem>>, vector<1x1x4x4xf32>
    %299 = vector.shape_cast %298 : vector<1x1x4x4xf32> to vector<4x4xf32>
    %cst_244 = arith.constant dense<0.000000e+00> : vector<4x256xf32>
    %300 = tpu.matmul %299, %234, %cst_244 {dimension_numbers = #tpu.dot_dimension_numbers<[1], [0], [0], [1], [0, 0, 1, 1], [], []>} : vector<4x4xf32>, vector<4x256xf32>, vector<4x256xf32> -> vector<4x256xf32>
    %301 = arith.addf %297, %300 : vector<4x256xf32>
    %c2_245 = arith.constant 2 : index
    %c3_246 = arith.constant 3 : index
    %c0_247 = arith.constant 0 : index
    %c0_248 = arith.constant 0 : index
    %302 = vector.load %arg3[%c2_245, %c3_246, %c0_247, %c0_248] : memref<6x9x4x4xf32, #tpu.memory_space<vmem>>, vector<1x1x4x4xf32>
    %303 = vector.shape_cast %302 : vector<1x1x4x4xf32> to vector<4x4xf32>
    %cst_249 = arith.constant dense<0.000000e+00> : vector<4x256xf32>
    %304 = tpu.matmul %303, %242, %cst_249 {dimension_numbers = #tpu.dot_dimension_numbers<[1], [0], [0], [1], [0, 0, 1, 1], [], []>} : vector<4x4xf32>, vector<4x256xf32>, vector<4x256xf32> -> vector<4x256xf32>
    %305 = arith.addf %301, %304 : vector<4x256xf32>
    %c2_250 = arith.constant 2 : index
    %c4_251 = arith.constant 4 : index
    %c0_252 = arith.constant 0 : index
    %c0_253 = arith.constant 0 : index
    %306 = vector.load %arg3[%c2_250, %c4_251, %c0_252, %c0_253] : memref<6x9x4x4xf32, #tpu.memory_space<vmem>>, vector<1x1x4x4xf32>
    %307 = vector.shape_cast %306 : vector<1x1x4x4xf32> to vector<4x4xf32>
    %cst_254 = arith.constant dense<0.000000e+00> : vector<4x256xf32>
    %308 = tpu.matmul %307, %245, %cst_254 {dimension_numbers = #tpu.dot_dimension_numbers<[1], [0], [0], [1], [0, 0, 1, 1], [], []>} : vector<4x4xf32>, vector<4x256xf32>, vector<4x256xf32> -> vector<4x256xf32>
    %309 = arith.addf %305, %308 : vector<4x256xf32>
    %c2_255 = arith.constant 2 : index
    %c5_256 = arith.constant 5 : index
    %c0_257 = arith.constant 0 : index
    %c0_258 = arith.constant 0 : index
    %310 = vector.load %arg3[%c2_255, %c5_256, %c0_257, %c0_258] : memref<6x9x4x4xf32, #tpu.memory_space<vmem>>, vector<1x1x4x4xf32>
    %311 = vector.shape_cast %310 : vector<1x1x4x4xf32> to vector<4x4xf32>
    %cst_259 = arith.constant dense<0.000000e+00> : vector<4x256xf32>
    %312 = tpu.matmul %311, %253, %cst_259 {dimension_numbers = #tpu.dot_dimension_numbers<[1], [0], [0], [1], [0, 0, 1, 1], [], []>} : vector<4x4xf32>, vector<4x256xf32>, vector<4x256xf32> -> vector<4x256xf32>
    %313 = arith.addf %309, %312 : vector<4x256xf32>
    %c2_260 = arith.constant 2 : index
    %c6_261 = arith.constant 6 : index
    %c0_262 = arith.constant 0 : index
    %c0_263 = arith.constant 0 : index
    %314 = vector.load %arg3[%c2_260, %c6_261, %c0_262, %c0_263] : memref<6x9x4x4xf32, #tpu.memory_space<vmem>>, vector<1x1x4x4xf32>
    %315 = vector.shape_cast %314 : vector<1x1x4x4xf32> to vector<4x4xf32>
    %cst_264 = arith.constant dense<0.000000e+00> : vector<4x256xf32>
    %316 = tpu.matmul %315, %261, %cst_264 {dimension_numbers = #tpu.dot_dimension_numbers<[1], [0], [0], [1], [0, 0, 1, 1], [], []>} : vector<4x4xf32>, vector<4x256xf32>, vector<4x256xf32> -> vector<4x256xf32>
    %317 = arith.addf %313, %316 : vector<4x256xf32>
    %c2_265 = arith.constant 2 : index
    %c7_266 = arith.constant 7 : index
    %c0_267 = arith.constant 0 : index
    %c0_268 = arith.constant 0 : index
    %318 = vector.load %arg3[%c2_265, %c7_266, %c0_267, %c0_268] : memref<6x9x4x4xf32, #tpu.memory_space<vmem>>, vector<1x1x4x4xf32>
    %319 = vector.shape_cast %318 : vector<1x1x4x4xf32> to vector<4x4xf32>
    %cst_269 = arith.constant dense<0.000000e+00> : vector<4x256xf32>
    %320 = tpu.matmul %319, %269, %cst_269 {dimension_numbers = #tpu.dot_dimension_numbers<[1], [0], [0], [1], [0, 0, 1, 1], [], []>} : vector<4x4xf32>, vector<4x256xf32>, vector<4x256xf32> -> vector<4x256xf32>
    %321 = arith.addf %317, %320 : vector<4x256xf32>
    %c2_270 = arith.constant 2 : index
    %c8_271 = arith.constant 8 : index
    %c0_272 = arith.constant 0 : index
    %c0_273 = arith.constant 0 : index
    %322 = vector.load %arg3[%c2_270, %c8_271, %c0_272, %c0_273] : memref<6x9x4x4xf32, #tpu.memory_space<vmem>>, vector<1x1x4x4xf32>
    %323 = vector.shape_cast %322 : vector<1x1x4x4xf32> to vector<4x4xf32>
    %cst_274 = arith.constant dense<0.000000e+00> : vector<4x256xf32>
    %324 = tpu.matmul %323, %277, %cst_274 {dimension_numbers = #tpu.dot_dimension_numbers<[1], [0], [0], [1], [0, 0, 1, 1], [], []>} : vector<4x4xf32>, vector<4x256xf32>, vector<4x256xf32> -> vector<4x256xf32>
    %325 = arith.addf %321, %324 : vector<4x256xf32>
    %326 = arith.addf %163, %325 : vector<4x256xf32>
    %c4_275 = arith.constant 4 : index
    %327 = memref.load %arg1[%c4_275] : memref<6xf32, #tpu.memory_space<smem>>
    %328 = vector.broadcast %327 : f32 to vector<4x256xf32>
    %329 = arith.mulf %328, %115 : vector<4x256xf32>
    %c4_276 = arith.constant 4 : index
    %c0_277 = arith.constant 0 : index
    %c0_278 = arith.constant 0 : index
    %330 = vector.load %arg5[%c4_276, %c0_277, %c0_278] : memref<6x1x256xf32, #tpu.memory_space<vmem>>, vector<1x1x256xf32>
    %331 = vector.shape_cast %330 : vector<1x1x256xf32> to vector<1x256xf32>
    %332 = vector.broadcast %331 : vector<1x256xf32> to vector<4x256xf32>
    %333 = arith.mulf %275, %332 : vector<4x256xf32>
    %334 = arith.addf %329, %333 : vector<4x256xf32>
    %c4_279 = arith.constant 4 : index
    %c0_280 = arith.constant 0 : index
    %c0_281 = arith.constant 0 : index
    %335 = vector.load %arg4[%c4_279, %c0_280, %c0_281] : memref<6x4x1xf32, #tpu.memory_space<vmem>>, vector<1x4x1xf32>
    %336 = vector.shape_cast %335 : vector<1x4x1xf32> to vector<4x1xf32>
    %337 = vector.broadcast %336 : vector<4x1xf32> to vector<4x256xf32>
    %338 = arith.addf %334, %337 : vector<4x256xf32>
    %c4_282 = arith.constant 4 : index
    %c0_283 = arith.constant 0 : index
    %c0_284 = arith.constant 0 : index
    %c0_285 = arith.constant 0 : index
    %339 = vector.load %arg3[%c4_282, %c0_283, %c0_284, %c0_285] : memref<6x9x4x4xf32, #tpu.memory_space<vmem>>, vector<1x1x4x4xf32>
    %340 = vector.shape_cast %339 : vector<1x1x4x4xf32> to vector<4x4xf32>
    %cst_286 = arith.constant dense<0.000000e+00> : vector<4x256xf32>
    %341 = tpu.matmul %340, %218, %cst_286 {dimension_numbers = #tpu.dot_dimension_numbers<[1], [0], [0], [1], [0, 0, 1, 1], [], []>} : vector<4x4xf32>, vector<4x256xf32>, vector<4x256xf32> -> vector<4x256xf32>
    %342 = arith.addf %338, %341 : vector<4x256xf32>
    %c4_287 = arith.constant 4 : index
    %c1_288 = arith.constant 1 : index
    %c0_289 = arith.constant 0 : index
    %c0_290 = arith.constant 0 : index
    %343 = vector.load %arg3[%c4_287, %c1_288, %c0_289, %c0_290] : memref<6x9x4x4xf32, #tpu.memory_space<vmem>>, vector<1x1x4x4xf32>
    %344 = vector.shape_cast %343 : vector<1x1x4x4xf32> to vector<4x4xf32>
    %cst_291 = arith.constant dense<0.000000e+00> : vector<4x256xf32>
    %345 = tpu.matmul %344, %226, %cst_291 {dimension_numbers = #tpu.dot_dimension_numbers<[1], [0], [0], [1], [0, 0, 1, 1], [], []>} : vector<4x4xf32>, vector<4x256xf32>, vector<4x256xf32> -> vector<4x256xf32>
    %346 = arith.addf %342, %345 : vector<4x256xf32>
    %c4_292 = arith.constant 4 : index
    %c2_293 = arith.constant 2 : index
    %c0_294 = arith.constant 0 : index
    %c0_295 = arith.constant 0 : index
    %347 = vector.load %arg3[%c4_292, %c2_293, %c0_294, %c0_295] : memref<6x9x4x4xf32, #tpu.memory_space<vmem>>, vector<1x1x4x4xf32>
    %348 = vector.shape_cast %347 : vector<1x1x4x4xf32> to vector<4x4xf32>
    %cst_296 = arith.constant dense<0.000000e+00> : vector<4x256xf32>
    %349 = tpu.matmul %348, %234, %cst_296 {dimension_numbers = #tpu.dot_dimension_numbers<[1], [0], [0], [1], [0, 0, 1, 1], [], []>} : vector<4x4xf32>, vector<4x256xf32>, vector<4x256xf32> -> vector<4x256xf32>
    %350 = arith.addf %346, %349 : vector<4x256xf32>
    %c4_297 = arith.constant 4 : index
    %c3_298 = arith.constant 3 : index
    %c0_299 = arith.constant 0 : index
    %c0_300 = arith.constant 0 : index
    %351 = vector.load %arg3[%c4_297, %c3_298, %c0_299, %c0_300] : memref<6x9x4x4xf32, #tpu.memory_space<vmem>>, vector<1x1x4x4xf32>
    %352 = vector.shape_cast %351 : vector<1x1x4x4xf32> to vector<4x4xf32>
    %cst_301 = arith.constant dense<0.000000e+00> : vector<4x256xf32>
    %353 = tpu.matmul %352, %242, %cst_301 {dimension_numbers = #tpu.dot_dimension_numbers<[1], [0], [0], [1], [0, 0, 1, 1], [], []>} : vector<4x4xf32>, vector<4x256xf32>, vector<4x256xf32> -> vector<4x256xf32>
    %354 = arith.addf %350, %353 : vector<4x256xf32>
    %c4_302 = arith.constant 4 : index
    %c4_303 = arith.constant 4 : index
    %c0_304 = arith.constant 0 : index
    %c0_305 = arith.constant 0 : index
    %355 = vector.load %arg3[%c4_302, %c4_303, %c0_304, %c0_305] : memref<6x9x4x4xf32, #tpu.memory_space<vmem>>, vector<1x1x4x4xf32>
    %356 = vector.shape_cast %355 : vector<1x1x4x4xf32> to vector<4x4xf32>
    %cst_306 = arith.constant dense<0.000000e+00> : vector<4x256xf32>
    %357 = tpu.matmul %356, %245, %cst_306 {dimension_numbers = #tpu.dot_dimension_numbers<[1], [0], [0], [1], [0, 0, 1, 1], [], []>} : vector<4x4xf32>, vector<4x256xf32>, vector<4x256xf32> -> vector<4x256xf32>
    %358 = arith.addf %354, %357 : vector<4x256xf32>
    %c4_307 = arith.constant 4 : index
    %c5_308 = arith.constant 5 : index
    %c0_309 = arith.constant 0 : index
    %c0_310 = arith.constant 0 : index
    %359 = vector.load %arg3[%c4_307, %c5_308, %c0_309, %c0_310] : memref<6x9x4x4xf32, #tpu.memory_space<vmem>>, vector<1x1x4x4xf32>
    %360 = vector.shape_cast %359 : vector<1x1x4x4xf32> to vector<4x4xf32>
    %cst_311 = arith.constant dense<0.000000e+00> : vector<4x256xf32>
    %361 = tpu.matmul %360, %253, %cst_311 {dimension_numbers = #tpu.dot_dimension_numbers<[1], [0], [0], [1], [0, 0, 1, 1], [], []>} : vector<4x4xf32>, vector<4x256xf32>, vector<4x256xf32> -> vector<4x256xf32>
    %362 = arith.addf %358, %361 : vector<4x256xf32>
    %c4_312 = arith.constant 4 : index
    %c6_313 = arith.constant 6 : index
    %c0_314 = arith.constant 0 : index
    %c0_315 = arith.constant 0 : index
    %363 = vector.load %arg3[%c4_312, %c6_313, %c0_314, %c0_315] : memref<6x9x4x4xf32, #tpu.memory_space<vmem>>, vector<1x1x4x4xf32>
    %364 = vector.shape_cast %363 : vector<1x1x4x4xf32> to vector<4x4xf32>
    %cst_316 = arith.constant dense<0.000000e+00> : vector<4x256xf32>
    %365 = tpu.matmul %364, %261, %cst_316 {dimension_numbers = #tpu.dot_dimension_numbers<[1], [0], [0], [1], [0, 0, 1, 1], [], []>} : vector<4x4xf32>, vector<4x256xf32>, vector<4x256xf32> -> vector<4x256xf32>
    %366 = arith.addf %362, %365 : vector<4x256xf32>
    %c4_317 = arith.constant 4 : index
    %c7_318 = arith.constant 7 : index
    %c0_319 = arith.constant 0 : index
    %c0_320 = arith.constant 0 : index
    %367 = vector.load %arg3[%c4_317, %c7_318, %c0_319, %c0_320] : memref<6x9x4x4xf32, #tpu.memory_space<vmem>>, vector<1x1x4x4xf32>
    %368 = vector.shape_cast %367 : vector<1x1x4x4xf32> to vector<4x4xf32>
    %cst_321 = arith.constant dense<0.000000e+00> : vector<4x256xf32>
    %369 = tpu.matmul %368, %269, %cst_321 {dimension_numbers = #tpu.dot_dimension_numbers<[1], [0], [0], [1], [0, 0, 1, 1], [], []>} : vector<4x4xf32>, vector<4x256xf32>, vector<4x256xf32> -> vector<4x256xf32>
    %370 = arith.addf %366, %369 : vector<4x256xf32>
    %c4_322 = arith.constant 4 : index
    %c8_323 = arith.constant 8 : index
    %c0_324 = arith.constant 0 : index
    %c0_325 = arith.constant 0 : index
    %371 = vector.load %arg3[%c4_322, %c8_323, %c0_324, %c0_325] : memref<6x9x4x4xf32, #tpu.memory_space<vmem>>, vector<1x1x4x4xf32>
    %372 = vector.shape_cast %371 : vector<1x1x4x4xf32> to vector<4x4xf32>
    %cst_326 = arith.constant dense<0.000000e+00> : vector<4x256xf32>
    %373 = tpu.matmul %372, %277, %cst_326 {dimension_numbers = #tpu.dot_dimension_numbers<[1], [0], [0], [1], [0, 0, 1, 1], [], []>} : vector<4x4xf32>, vector<4x256xf32>, vector<4x256xf32> -> vector<4x256xf32>
    %374 = arith.addf %370, %373 : vector<4x256xf32>
    %375 = arith.addf %211, %374 : vector<4x256xf32>
    %c17_i32_327 = arith.constant 17 : i32
    %376 = tpu.dynamic_rotate %326 by %c17_i32_327 dim 1 : vector<4x256xf32>, i32 -> vector<4x256xf32>
    %c0_328 = arith.constant 0 : index
    %c0_329 = arith.constant 0 : index
    %c0_330 = arith.constant 0 : index
    %377 = vector.load %arg6[%c0_328, %c0_329, %c0_330] : memref<9x1x256xf32, #tpu.memory_space<vmem>>, vector<1x1x256xf32>
    %378 = vector.shape_cast %377 : vector<1x1x256xf32> to vector<1x256xf32>
    %379 = vector.broadcast %378 : vector<1x256xf32> to vector<4x256xf32>
    %380 = arith.mulf %376, %379 : vector<4x256xf32>
    %cst_331 = arith.constant 0.000000e+00 : f32
    %381 = vector.broadcast %cst_331 : f32 to vector<4x256xf32>
    %382 = arith.maximumf %380, %381 : vector<4x256xf32>
    %c16_i32_332 = arith.constant 16 : i32
    %383 = tpu.dynamic_rotate %326 by %c16_i32_332 dim 1 : vector<4x256xf32>, i32 -> vector<4x256xf32>
    %c1_333 = arith.constant 1 : index
    %c0_334 = arith.constant 0 : index
    %c0_335 = arith.constant 0 : index
    %384 = vector.load %arg6[%c1_333, %c0_334, %c0_335] : memref<9x1x256xf32, #tpu.memory_space<vmem>>, vector<1x1x256xf32>
    %385 = vector.shape_cast %384 : vector<1x1x256xf32> to vector<1x256xf32>
    %386 = vector.broadcast %385 : vector<1x256xf32> to vector<4x256xf32>
    %387 = arith.mulf %383, %386 : vector<4x256xf32>
    %388 = arith.addf %380, %387 : vector<4x256xf32>
    %cst_336 = arith.constant 0.000000e+00 : f32
    %389 = vector.broadcast %cst_336 : f32 to vector<4x256xf32>
    %390 = arith.maximumf %387, %389 : vector<4x256xf32>
    %c15_i32_337 = arith.constant 15 : i32
    %391 = tpu.dynamic_rotate %326 by %c15_i32_337 dim 1 : vector<4x256xf32>, i32 -> vector<4x256xf32>
    %c2_338 = arith.constant 2 : index
    %c0_339 = arith.constant 0 : index
    %c0_340 = arith.constant 0 : index
    %392 = vector.load %arg6[%c2_338, %c0_339, %c0_340] : memref<9x1x256xf32, #tpu.memory_space<vmem>>, vector<1x1x256xf32>
    %393 = vector.shape_cast %392 : vector<1x1x256xf32> to vector<1x256xf32>
    %394 = vector.broadcast %393 : vector<1x256xf32> to vector<4x256xf32>
    %395 = arith.mulf %391, %394 : vector<4x256xf32>
    %396 = arith.addf %388, %395 : vector<4x256xf32>
    %cst_341 = arith.constant 0.000000e+00 : f32
    %397 = vector.broadcast %cst_341 : f32 to vector<4x256xf32>
    %398 = arith.maximumf %395, %397 : vector<4x256xf32>
    %c1_i32_342 = arith.constant 1 : i32
    %399 = tpu.dynamic_rotate %326 by %c1_i32_342 dim 1 : vector<4x256xf32>, i32 -> vector<4x256xf32>
    %c3_343 = arith.constant 3 : index
    %c0_344 = arith.constant 0 : index
    %c0_345 = arith.constant 0 : index
    %400 = vector.load %arg6[%c3_343, %c0_344, %c0_345] : memref<9x1x256xf32, #tpu.memory_space<vmem>>, vector<1x1x256xf32>
    %401 = vector.shape_cast %400 : vector<1x1x256xf32> to vector<1x256xf32>
    %402 = vector.broadcast %401 : vector<1x256xf32> to vector<4x256xf32>
    %403 = arith.mulf %399, %402 : vector<4x256xf32>
    %404 = arith.addf %396, %403 : vector<4x256xf32>
    %cst_346 = arith.constant 0.000000e+00 : f32
    %405 = vector.broadcast %cst_346 : f32 to vector<4x256xf32>
    %406 = arith.maximumf %403, %405 : vector<4x256xf32>
    %407 = arith.addf %404, %326 : vector<4x256xf32>
    %cst_347 = arith.constant 0.000000e+00 : f32
    %408 = vector.broadcast %cst_347 : f32 to vector<4x256xf32>
    %409 = arith.maximumf %326, %408 : vector<4x256xf32>
    %c255_i32_348 = arith.constant 255 : i32
    %410 = tpu.dynamic_rotate %326 by %c255_i32_348 dim 1 : vector<4x256xf32>, i32 -> vector<4x256xf32>
    %c5_349 = arith.constant 5 : index
    %c0_350 = arith.constant 0 : index
    %c0_351 = arith.constant 0 : index
    %411 = vector.load %arg6[%c5_349, %c0_350, %c0_351] : memref<9x1x256xf32, #tpu.memory_space<vmem>>, vector<1x1x256xf32>
    %412 = vector.shape_cast %411 : vector<1x1x256xf32> to vector<1x256xf32>
    %413 = vector.broadcast %412 : vector<1x256xf32> to vector<4x256xf32>
    %414 = arith.mulf %410, %413 : vector<4x256xf32>
    %415 = arith.addf %407, %414 : vector<4x256xf32>
    %cst_352 = arith.constant 0.000000e+00 : f32
    %416 = vector.broadcast %cst_352 : f32 to vector<4x256xf32>
    %417 = arith.maximumf %414, %416 : vector<4x256xf32>
    %c241_i32_353 = arith.constant 241 : i32
    %418 = tpu.dynamic_rotate %326 by %c241_i32_353 dim 1 : vector<4x256xf32>, i32 -> vector<4x256xf32>
    %c6_354 = arith.constant 6 : index
    %c0_355 = arith.constant 0 : index
    %c0_356 = arith.constant 0 : index
    %419 = vector.load %arg6[%c6_354, %c0_355, %c0_356] : memref<9x1x256xf32, #tpu.memory_space<vmem>>, vector<1x1x256xf32>
    %420 = vector.shape_cast %419 : vector<1x1x256xf32> to vector<1x256xf32>
    %421 = vector.broadcast %420 : vector<1x256xf32> to vector<4x256xf32>
    %422 = arith.mulf %418, %421 : vector<4x256xf32>
    %423 = arith.addf %415, %422 : vector<4x256xf32>
    %cst_357 = arith.constant 0.000000e+00 : f32
    %424 = vector.broadcast %cst_357 : f32 to vector<4x256xf32>
    %425 = arith.maximumf %422, %424 : vector<4x256xf32>
    %c240_i32_358 = arith.constant 240 : i32
    %426 = tpu.dynamic_rotate %326 by %c240_i32_358 dim 1 : vector<4x256xf32>, i32 -> vector<4x256xf32>
    %c7_359 = arith.constant 7 : index
    %c0_360 = arith.constant 0 : index
    %c0_361 = arith.constant 0 : index
    %427 = vector.load %arg6[%c7_359, %c0_360, %c0_361] : memref<9x1x256xf32, #tpu.memory_space<vmem>>, vector<1x1x256xf32>
    %428 = vector.shape_cast %427 : vector<1x1x256xf32> to vector<1x256xf32>
    %429 = vector.broadcast %428 : vector<1x256xf32> to vector<4x256xf32>
    %430 = arith.mulf %426, %429 : vector<4x256xf32>
    %431 = arith.addf %423, %430 : vector<4x256xf32>
    %cst_362 = arith.constant 0.000000e+00 : f32
    %432 = vector.broadcast %cst_362 : f32 to vector<4x256xf32>
    %433 = arith.maximumf %430, %432 : vector<4x256xf32>
    %c239_i32_363 = arith.constant 239 : i32
    %434 = tpu.dynamic_rotate %326 by %c239_i32_363 dim 1 : vector<4x256xf32>, i32 -> vector<4x256xf32>
    %c8_364 = arith.constant 8 : index
    %c0_365 = arith.constant 0 : index
    %c0_366 = arith.constant 0 : index
    %435 = vector.load %arg6[%c8_364, %c0_365, %c0_366] : memref<9x1x256xf32, #tpu.memory_space<vmem>>, vector<1x1x256xf32>
    %436 = vector.shape_cast %435 : vector<1x1x256xf32> to vector<1x256xf32>
    %437 = vector.broadcast %436 : vector<1x256xf32> to vector<4x256xf32>
    %438 = arith.mulf %434, %437 : vector<4x256xf32>
    %439 = arith.addf %431, %438 : vector<4x256xf32>
    %cst_367 = arith.constant 0.000000e+00 : f32
    %440 = vector.broadcast %cst_367 : f32 to vector<4x256xf32>
    %441 = arith.maximumf %438, %440 : vector<4x256xf32>
    %c5_368 = arith.constant 5 : index
    %442 = memref.load %arg1[%c5_368] : memref<6xf32, #tpu.memory_space<smem>>
    %443 = vector.broadcast %442 : f32 to vector<4x256xf32>
    %444 = arith.mulf %443, %326 : vector<4x256xf32>
    %c5_369 = arith.constant 5 : index
    %c0_370 = arith.constant 0 : index
    %c0_371 = arith.constant 0 : index
    %445 = vector.load %arg5[%c5_369, %c0_370, %c0_371] : memref<6x1x256xf32, #tpu.memory_space<vmem>>, vector<1x1x256xf32>
    %446 = vector.shape_cast %445 : vector<1x1x256xf32> to vector<1x256xf32>
    %447 = vector.broadcast %446 : vector<1x256xf32> to vector<4x256xf32>
    %448 = arith.mulf %439, %447 : vector<4x256xf32>
    %449 = arith.addf %444, %448 : vector<4x256xf32>
    %c5_372 = arith.constant 5 : index
    %c0_373 = arith.constant 0 : index
    %c0_374 = arith.constant 0 : index
    %450 = vector.load %arg4[%c5_372, %c0_373, %c0_374] : memref<6x4x1xf32, #tpu.memory_space<vmem>>, vector<1x4x1xf32>
    %451 = vector.shape_cast %450 : vector<1x4x1xf32> to vector<4x1xf32>
    %452 = vector.broadcast %451 : vector<4x1xf32> to vector<4x256xf32>
    %453 = arith.addf %449, %452 : vector<4x256xf32>
    %c5_375 = arith.constant 5 : index
    %c0_376 = arith.constant 0 : index
    %c0_377 = arith.constant 0 : index
    %c0_378 = arith.constant 0 : index
    %454 = vector.load %arg3[%c5_375, %c0_376, %c0_377, %c0_378] : memref<6x9x4x4xf32, #tpu.memory_space<vmem>>, vector<1x1x4x4xf32>
    %455 = vector.shape_cast %454 : vector<1x1x4x4xf32> to vector<4x4xf32>
    %cst_379 = arith.constant dense<0.000000e+00> : vector<4x256xf32>
    %456 = tpu.matmul %455, %382, %cst_379 {dimension_numbers = #tpu.dot_dimension_numbers<[1], [0], [0], [1], [0, 0, 1, 1], [], []>} : vector<4x4xf32>, vector<4x256xf32>, vector<4x256xf32> -> vector<4x256xf32>
    %457 = arith.addf %453, %456 : vector<4x256xf32>
    %c5_380 = arith.constant 5 : index
    %c1_381 = arith.constant 1 : index
    %c0_382 = arith.constant 0 : index
    %c0_383 = arith.constant 0 : index
    %458 = vector.load %arg3[%c5_380, %c1_381, %c0_382, %c0_383] : memref<6x9x4x4xf32, #tpu.memory_space<vmem>>, vector<1x1x4x4xf32>
    %459 = vector.shape_cast %458 : vector<1x1x4x4xf32> to vector<4x4xf32>
    %cst_384 = arith.constant dense<0.000000e+00> : vector<4x256xf32>
    %460 = tpu.matmul %459, %390, %cst_384 {dimension_numbers = #tpu.dot_dimension_numbers<[1], [0], [0], [1], [0, 0, 1, 1], [], []>} : vector<4x4xf32>, vector<4x256xf32>, vector<4x256xf32> -> vector<4x256xf32>
    %461 = arith.addf %457, %460 : vector<4x256xf32>
    %c5_385 = arith.constant 5 : index
    %c2_386 = arith.constant 2 : index
    %c0_387 = arith.constant 0 : index
    %c0_388 = arith.constant 0 : index
    %462 = vector.load %arg3[%c5_385, %c2_386, %c0_387, %c0_388] : memref<6x9x4x4xf32, #tpu.memory_space<vmem>>, vector<1x1x4x4xf32>
    %463 = vector.shape_cast %462 : vector<1x1x4x4xf32> to vector<4x4xf32>
    %cst_389 = arith.constant dense<0.000000e+00> : vector<4x256xf32>
    %464 = tpu.matmul %463, %398, %cst_389 {dimension_numbers = #tpu.dot_dimension_numbers<[1], [0], [0], [1], [0, 0, 1, 1], [], []>} : vector<4x4xf32>, vector<4x256xf32>, vector<4x256xf32> -> vector<4x256xf32>
    %465 = arith.addf %461, %464 : vector<4x256xf32>
    %c5_390 = arith.constant 5 : index
    %c3_391 = arith.constant 3 : index
    %c0_392 = arith.constant 0 : index
    %c0_393 = arith.constant 0 : index
    %466 = vector.load %arg3[%c5_390, %c3_391, %c0_392, %c0_393] : memref<6x9x4x4xf32, #tpu.memory_space<vmem>>, vector<1x1x4x4xf32>
    %467 = vector.shape_cast %466 : vector<1x1x4x4xf32> to vector<4x4xf32>
    %cst_394 = arith.constant dense<0.000000e+00> : vector<4x256xf32>
    %468 = tpu.matmul %467, %406, %cst_394 {dimension_numbers = #tpu.dot_dimension_numbers<[1], [0], [0], [1], [0, 0, 1, 1], [], []>} : vector<4x4xf32>, vector<4x256xf32>, vector<4x256xf32> -> vector<4x256xf32>
    %469 = arith.addf %465, %468 : vector<4x256xf32>
    %c5_395 = arith.constant 5 : index
    %c4_396 = arith.constant 4 : index
    %c0_397 = arith.constant 0 : index
    %c0_398 = arith.constant 0 : index
    %470 = vector.load %arg3[%c5_395, %c4_396, %c0_397, %c0_398] : memref<6x9x4x4xf32, #tpu.memory_space<vmem>>, vector<1x1x4x4xf32>
    %471 = vector.shape_cast %470 : vector<1x1x4x4xf32> to vector<4x4xf32>
    %cst_399 = arith.constant dense<0.000000e+00> : vector<4x256xf32>
    %472 = tpu.matmul %471, %409, %cst_399 {dimension_numbers = #tpu.dot_dimension_numbers<[1], [0], [0], [1], [0, 0, 1, 1], [], []>} : vector<4x4xf32>, vector<4x256xf32>, vector<4x256xf32> -> vector<4x256xf32>
    %473 = arith.addf %469, %472 : vector<4x256xf32>
    %c5_400 = arith.constant 5 : index
    %c5_401 = arith.constant 5 : index
    %c0_402 = arith.constant 0 : index
    %c0_403 = arith.constant 0 : index
    %474 = vector.load %arg3[%c5_400, %c5_401, %c0_402, %c0_403] : memref<6x9x4x4xf32, #tpu.memory_space<vmem>>, vector<1x1x4x4xf32>
    %475 = vector.shape_cast %474 : vector<1x1x4x4xf32> to vector<4x4xf32>
    %cst_404 = arith.constant dense<0.000000e+00> : vector<4x256xf32>
    %476 = tpu.matmul %475, %417, %cst_404 {dimension_numbers = #tpu.dot_dimension_numbers<[1], [0], [0], [1], [0, 0, 1, 1], [], []>} : vector<4x4xf32>, vector<4x256xf32>, vector<4x256xf32> -> vector<4x256xf32>
    %477 = arith.addf %473, %476 : vector<4x256xf32>
    %c5_405 = arith.constant 5 : index
    %c6_406 = arith.constant 6 : index
    %c0_407 = arith.constant 0 : index
    %c0_408 = arith.constant 0 : index
    %478 = vector.load %arg3[%c5_405, %c6_406, %c0_407, %c0_408] : memref<6x9x4x4xf32, #tpu.memory_space<vmem>>, vector<1x1x4x4xf32>
    %479 = vector.shape_cast %478 : vector<1x1x4x4xf32> to vector<4x4xf32>
    %cst_409 = arith.constant dense<0.000000e+00> : vector<4x256xf32>
    %480 = tpu.matmul %479, %425, %cst_409 {dimension_numbers = #tpu.dot_dimension_numbers<[1], [0], [0], [1], [0, 0, 1, 1], [], []>} : vector<4x4xf32>, vector<4x256xf32>, vector<4x256xf32> -> vector<4x256xf32>
    %481 = arith.addf %477, %480 : vector<4x256xf32>
    %c5_410 = arith.constant 5 : index
    %c7_411 = arith.constant 7 : index
    %c0_412 = arith.constant 0 : index
    %c0_413 = arith.constant 0 : index
    %482 = vector.load %arg3[%c5_410, %c7_411, %c0_412, %c0_413] : memref<6x9x4x4xf32, #tpu.memory_space<vmem>>, vector<1x1x4x4xf32>
    %483 = vector.shape_cast %482 : vector<1x1x4x4xf32> to vector<4x4xf32>
    %cst_414 = arith.constant dense<0.000000e+00> : vector<4x256xf32>
    %484 = tpu.matmul %483, %433, %cst_414 {dimension_numbers = #tpu.dot_dimension_numbers<[1], [0], [0], [1], [0, 0, 1, 1], [], []>} : vector<4x4xf32>, vector<4x256xf32>, vector<4x256xf32> -> vector<4x256xf32>
    %485 = arith.addf %481, %484 : vector<4x256xf32>
    %c5_415 = arith.constant 5 : index
    %c8_416 = arith.constant 8 : index
    %c0_417 = arith.constant 0 : index
    %c0_418 = arith.constant 0 : index
    %486 = vector.load %arg3[%c5_415, %c8_416, %c0_417, %c0_418] : memref<6x9x4x4xf32, #tpu.memory_space<vmem>>, vector<1x1x4x4xf32>
    %487 = vector.shape_cast %486 : vector<1x1x4x4xf32> to vector<4x4xf32>
    %cst_419 = arith.constant dense<0.000000e+00> : vector<4x256xf32>
    %488 = tpu.matmul %487, %441, %cst_419 {dimension_numbers = #tpu.dot_dimension_numbers<[1], [0], [0], [1], [0, 0, 1, 1], [], []>} : vector<4x4xf32>, vector<4x256xf32>, vector<4x256xf32> -> vector<4x256xf32>
    %489 = arith.addf %485, %488 : vector<4x256xf32>
    %490 = arith.addf %375, %489 : vector<4x256xf32>
    %c0_420 = arith.constant 0 : index
    %c0_421 = arith.constant 0 : index
    %c0_422 = arith.constant 0 : index
    %491 = vector.load %arg7[%c0_420, %c0_421, %c0_422] : memref<1x4x256xf32, #tpu.memory_space<vmem>>, vector<1x4x256xf32>
    %492 = vector.shape_cast %491 : vector<1x4x256xf32> to vector<4x256xf32>
    %493 = vector.shape_cast %490 : vector<4x256xf32> to vector<1x4x256xf32>
    tpu.vector_store %arg7[%c0_420, %c0_421, %c0_422], %493 {strides = array<i32>} : memref<1x4x256xf32, #tpu.memory_space<vmem>>, vector<1x4x256xf32>,
    return
  }
  func.func @transform_0(%arg0: i32) -> i32 {
    %c0_i32 = arith.constant 0 : i32
    %c0_i32_0 = arith.constant 0 : i32
    return %c0_i32 : i32
  }
  func.func @transform_1(%arg0: i32) -> (i32, i32, i32) {
    %c0_i32 = arith.constant 0 : i32
    %c0_i32_0 = arith.constant 0 : i32
    %c0_i32_1 = arith.constant 0 : i32
    return %arg0, %c0_i32, %c0_i32_0 : i32, i32, i32
  }
  func.func @transform_2(%arg0: i32) -> (i32, i32, i32, i32) {
    %c0_i32 = arith.constant 0 : i32
    %c0_i32_0 = arith.constant 0 : i32
    %c0_i32_1 = arith.constant 0 : i32
    %c0_i32_2 = arith.constant 0 : i32
    %c0_i32_3 = arith.constant 0 : i32
    return %c0_i32, %c0_i32_0, %c0_i32_1, %c0_i32_2 : i32, i32, i32, i32
  }
  func.func @transform_3(%arg0: i32) -> (i32, i32, i32) {
    %c0_i32 = arith.constant 0 : i32
    %c0_i32_0 = arith.constant 0 : i32
    %c0_i32_1 = arith.constant 0 : i32
    %c0_i32_2 = arith.constant 0 : i32
    return %c0_i32, %c0_i32_0, %c0_i32_1 : i32, i32, i32
  }
  func.func @transform_4(%arg0: i32) -> (i32, i32, i32) {
    %c0_i32 = arith.constant 0 : i32
    %c0_i32_0 = arith.constant 0 : i32
    %c0_i32_1 = arith.constant 0 : i32
    %c0_i32_2 = arith.constant 0 : i32
    return %c0_i32, %c0_i32_0, %c0_i32_1 : i32, i32, i32
  }
  func.func @transform_5(%arg0: i32) -> (i32, i32, i32) {
    %c0_i32 = arith.constant 0 : i32
    %c0_i32_0 = arith.constant 0 : i32
    %c0_i32_1 = arith.constant 0 : i32
    %c0_i32_2 = arith.constant 0 : i32
    return %c0_i32, %c0_i32_0, %c0_i32_1 : i32, i32, i32
  }
  func.func @transform_6(%arg0: i32) -> (i32, i32, i32) {
    %c0_i32 = arith.constant 0 : i32
    %c0_i32_0 = arith.constant 0 : i32
    %c0_i32_1 = arith.constant 0 : i32
    return %arg0, %c0_i32, %c0_i32_0 : i32, i32, i32
  }
}

</mosaic_0001>

<bundles_post_ra>
// kernel: _forward_impl.1
= control target key start
LH: loop header
LB: loop body
LE: loop exit
PB: predicated region body
PF: predicated region fallthrough
CT: control target
= control target key end

     0   :  { %11 = vsyncpa [#allocation3], 0  ;;  %s5874_s21 = smov 0   ;;  %s7121_s0 = inlined_call_operand.vmem [shape: f32[6], index: 0, kind: input, shape index: {}]   ;;  %s7122_s1 = inlined_call_operand.vmem [shape: f32[2,4,256], index: 1, kind: input, shape index: {}]   ;;  %s7123_s2 = inlined_call_operand.vmem [shape: f32[6,9,4,4], index: 2, kind: input, shape index: {}]   ;;  %s7124_s3 = inlined_call_operand.vmem [shape: f32[6,4,1], index: 3, kind: input, shape index: {}]   ;;  %s7125_s4 = inlined_call_operand.vmem [shape: f32[6,1,256], index: 4, kind: input, shape index: {}]   ;;  %s7126_s5 = inlined_call_operand.vmem [shape: f32[9,1,256], index: 5, kind: input, shape index: {}]   ;;  %s7127_s6 = inlined_call_operand.vmem [shape: f32[2,4,256], index: 6, kind: output, shape index: {}]  }
   0x1 LB: > { %s5514_s22 = sadd.s32 4294967295, %s5825_s21   ;;  %p5516_p0 = scmp.ge.s32.totalorder %s5825_s21, 1  ;;  %s5825_s21 = sphi %s5874_s21, %s17_s21  }
   0x2   : > { %p179_p1 = scmp.lt.s32.totalorder %s5825_s21, 3  ;;  %s192_s25 = sshll.u32 %s7121_s0, 4  ;;  %s193_s25 = int_to_ptr.vmem [resolvable:$true] %s192_s25 }
   0x3   : > { %p5774_p3 = scmp.eq.s32.totalorder %s5514_s22, 0  ;;  %s5800_s27 = scalar_lea.vmem %s193_s25, 16 }
   0x4   : > { %p5885_p2 = pnand %p5516_p0, %p179_p1  ;;  %p5801_p6 = scmp.ne.s32.totalorder %s193_s25, %s5800_s27 }
   0x5   : > { %p5808_p10 = scmp.lt.s32.totalorder %s193_s25, %s193_s25  ;;  %p5809_p11 = scmp.lt.s32.totalorder %s5800_s27, %s5800_s27 }
   0x6   : > { %p5770_p4 = pneg %p5885_p2 }
   0x7   : > { %p5810_p12 = por %p5809_p11, %p5808_p10 }
   0x8   : > { %p5771_p5 = pnand %p5774_p3, %p5770_p4 }
   0xa   : > { %p5802_p7 = pneg %p5771_p5 }
   0xc   : > { %p5803_p8 = pnand %p5802_p7, %p5801_p6 }
   0xe   : > { %p5804_p9 = pneg %p5803_p8 }
  0x10   : > { %p5811_p13 = pnand %p5810_p12, %p5804_p9 }
  0x12   : > { %5814 = shalt.err (!%p5811_p13)
}
  0x13   : > { %s5827_s28 = smov [#allocation2]   ;;  %225 = sbr.rel (%p5885_p2) target bundleno = 1091 (0x443), region = 44 }
  0x14   : > { %5773 = dma.vmem_to_smem (!%p5771_p5), %s193_s25, 16, %s5827_s28, [#allocation3]  }
  0x18   : > { %5820 = dma.done.wait (%p5774_p3), [#allocation3], 16  }
  0x19   : > { %5822 = vsyncadd (%p5774_p3), [#allocation3], 4294967280 }
  0x1a   : > { %231 = sfence }
  0x1b   : > { %p256_p0 = scmp.lt.s32.totalorder %s5514_s22, 1  ;;  %v5828_v0 = vmov 0   ;;  %s5829_s9 = smov 16   ;;  %v7128_v3 = vmov 0.0   ;;  %v502_v4 = vld [vmem:[%s7124_s3] sm:$0xf]  ;;  %v274_v5 = vlaneseq }
  0x1c   : > { %5796 = vset.pattern.permute.xlu0 %v5828_v0  ;;  %5797 = vset.pattern.permute.xlu1 %v5828_v0  ;;  %s5830_s10 = smov 17   ;;  %s5832_s11 = smov 15   ;;  %v5525_v10 = vld [vmem:[%s7126_s5 + $0x2] sm:$0x3]  ;;  %v279_v15 = vld [vmem:[%s7126_s5] sm:$0x3] }
  0x1d   : > { %s7236_s22 = smov (!%p256_p0, %s5514_s22), 1  ;;  %592 = vmatprep.mubr.f32.mxu0 %v7128_v3  ;;  %679 = vmatprep.mubr.f32.mxu1 %v7128_v3  ;;  %s5833_s12 = smov 1   ;;  %v5950_v6 = vshrl.u32 %v274_v5, 7  ;;  %v5952_v7 = vand.u32 127, %v274_v5  ;;  %v5526_v18 = vld [vmem:[%s7126_s5 + $0x4] sm:$0x3] }
  0x1e   : > { %s5764_s29 = sshll.u32 %s7236_s22, 3  ;;  %s5834_s13 = smov 127   ;;  %v5527_v21 = vld [vmem:[%s7126_s5 + $0x6] sm:$0x3]  ;;  %vm521_vm3 = vcmask 1043456   ;;  %vm517_vm5 = vcmask 31744  }
  0x1f   : > { %s5904_s8 = scalar_lea.vmem %s7122_s1, %s5764_s29  ;;  %s5835_s14 = smov 113   ;;  %v5955_v8 = vsub.s32 0, %v5950_v6  ;;  %v5958_v9 = vsub.s32 1, %v5950_v6  ;;  %vm299_vm0 = vcmp.lt.s32.totalorder %v5952_v7, 16  ;;  %vm325_vm1 = vcmp.lt.s32.totalorder %v5952_v7, 15 }
  0x20   : > { %v5907_v1 = vld [vmem:[%s5904_s8] sm:$0xff]  ;;  %s5836_s15 = smov 112   ;;  %s5837_s16 = smov 111   ;;  %vm276_vm2 = vcmp.lt.s32.totalorder %v5952_v7, 17  ;;  %vm351_vm4 = vcmp.lt.s32.totalorder %v5952_v7, 1  ;;  %vm380_vm6 = vcmp.lt.s32.totalorder %v5952_v7, 127 }
  0x21   : > { %295 = vrot.lane.b32.xlu1 %v5907_v1, %s5829_s9  ;;  %270 = vrot.lane.b32.xlu0 %v5907_v1, %s5830_s10  ;;  %v5915_v2 = vcombine.high %v5907_v1, %v5907_v1  ;;  %7163 = vst [vmem:[#allocation5_spill] sm:$0xff] %v5955_v8  ;;  %v5965_v13 = vrot.slane %v5525_v10, %v5955_v8  ;;  %v5528_v37 = vld [vmem:[%s7126_s5 + $0xa] sm:$0x3]  ;;  %v5535_v38 = vld [vmem:[%s7123_s2 + $0x4] sm:$0xf]  ;;  %v6034_v44 = vmax.f32 %v5907_v1, 0.0  ;;  %s265_s25 = scalar_lea.vmem %s7127_s6, %s5764_s29 }
  0x22   : > { %v5968_v14 = vrot.slane %v5525_v10, %v5958_v9  ;;  %v5988_v24 = vrot.slane %v279_v15, %v5955_v8  ;;  %v5991_v25 = vrot.slane %v279_v15, %v5958_v9  ;;  %v5994_v26 = vrot.slane %v5526_v18, %v5955_v8  ;;  %v5529_v51 = vld [vmem:[%s7126_s5 + $0xc] sm:$0x3]  ;;  %v516_v60 = vld [vmem:[%s7123_s2] sm:$0xf]  ;;  %s480_s19 = sld [smem:[#allocation2]] }
  0x23   : > { %v5997_v27 = vrot.slane %v5526_v18, %v5958_v9  ;;  %v6005_v32 = vrot.slane %v5527_v21, %v5955_v8  ;;  %v6026_v41 = vrot.slane %v5527_v21, %v5958_v9  ;;  %v6037_v49 = vrot.slane %v5528_v37, %v5955_v8  ;;  %s5567_s20 = sld [smem:[#allocation2 + $0x1]] }
  0x24   : > { %7164 = vst [vmem:[#allocation6_spill] sm:$0xff] %v5968_v14  ;;  %7165 = vst [vmem:[#allocation7_spill] sm:$0xff] %v5994_v26  ;;  %v6040_v50 = vrot.slane %v5528_v37, %v5958_v9  ;;  %v6067_v63 = vrot.slane %v5529_v51, %v5955_v8  ;;  %v6071_v0 = vcombine.high %v6034_v44, %v6034_v44  ;;  %vm406_vm7 = vcmp.lt.s32.totalorder %v5952_v7, 113  ;;  %s5645_s23 = sld [smem:[#allocation2 + $0x2]] }
  0x25   : > { %321 = vrot.lane.b32.xlu0 %v5907_v1, %s5832_s11  ;;  %297 = vrot.lane.b32.xlu1 %v5915_v2, %s5829_s9  ;;  %7166 = vst [vmem:[#allocation8_spill] sm:$0xff] %v5997_v27  ;;  %7167 = vst [vmem:[#allocation9_spill] sm:$0xff] %v6005_v32  ;;  %v6088_v18 = vrot.slane %v5529_v51, %v5958_v9  ;;  %vm432_vm8 = vcmp.lt.s32.totalorder %v5952_v7, 112  ;;  %vm458_vm9 = vcmp.lt.s32.totalorder %v5952_v7, 111 }
  0x26   : > { %7168 = vst [vmem:[#allocation10_spill] sm:$0xff] %v6026_v41  ;;  %7169 = vst [vmem:[#allocation11_spill] sm:$0xff] %v6037_v49 }
  0x27   : > { %7170 = vst [vmem:[#allocation12_spill] sm:$0xff] %v6040_v50  ;;  %7171 = vst [vmem:[#allocation13_spill] sm:$0xff] %v6067_v63 }
  0x28   : > { %7172 = vst [vmem:[#allocation14_spill] sm:$0xff] %v6088_v18 }
  0x29   : > { %323 = vrot.lane.b32.xlu1 %v5915_v2, %s5832_s11  ;;  %272 = vrot.lane.b32.xlu0 %v5915_v2, %s5830_s10 }
  0x2d   : > { %349 = vrot.lane.b32.xlu1 %v5915_v2, %s5833_s12  ;;  %347 = vrot.lane.b32.xlu0 %v5907_v1, %s5833_s12 }
  0x31   : > { %378 = vrot.lane.b32.xlu1 %v5915_v2, %s5834_s13  ;;  %376 = vrot.lane.b32.xlu0 %v5907_v1, %s5834_s13 }
  0x35   : > { %404 = vrot.lane.b32.xlu1 %v5915_v2, %s5835_s14  ;;  %402 = vrot.lane.b32.xlu0 %v5907_v1, %s5835_s14 }
  0x39   : > { %430 = vrot.lane.b32.xlu1 %v5915_v2, %s5836_s15  ;;  %428 = vrot.lane.b32.xlu0 %v5907_v1, %s5836_s15 }
  0x3d   : > { %456 = vrot.lane.b32.xlu1 %v5915_v2, %s5837_s16  ;;  %454 = vrot.lane.b32.xlu0 %v5907_v1, %s5837_s16 }
  0x41   : > { %505 = vperm.xlu0 %5796, %v502_v4  }
  0x93   : > { %v296_v11 = vpop.permute.xlu1 %295  ;;  %v271_v12 = vpop.permute.xlu0 %270 }
  0x97   : > { %v322_v16 = vpop.permute.xlu0 %321  ;;  %v298_v17 = vpop.permute.xlu1 %297 }
  0x98   : > { %v300_v19 = vsel %vm299_vm0, %v296_v11, %v298_v17  ;;  %v301_v20 = vsel %vm299_vm0, %v298_v17, %v296_v11 }
  0x99   : > { %v315_v22 = vmul.f32 %v5965_v13, %v301_v20  ;;  %v316_v23 = vmul.f32 %v5968_v14, %v300_v19 }
  0x9b   : > { %v324_v28 = vpop.permute.xlu1 %323  ;;  %v273_v29 = vpop.permute.xlu0 %272  ;;  %v5999_v30 = vmax.f32 %v316_v23, 0.0  ;;  %v6001_v31 = vmax.f32 %v315_v22, 0.0 }
  0x9c   : > { %v326_v33 = vsel %vm325_vm1, %v322_v16, %v324_v28  ;;  %v327_v34 = vsel %vm325_vm1, %v324_v28, %v322_v16  ;;  %v277_v35 = vsel %vm276_vm2, %v271_v12, %v273_v29  ;;  %v278_v36 = vsel %vm276_vm2, %v273_v29, %v271_v12  ;;  %v5543_v28 = vld [vmem:[%s7123_s2 + $0xc] sm:$0xf] }
  0x9d   : > { %v291_v39 = vmul.f32 %v5988_v24, %v278_v36  ;;  %v292_v40 = vmul.f32 %v5991_v25, %v277_v35  ;;  %5536 = vmatprep.subr.msk.mxu1 %vm521_vm3, %v5999_v30  ;;  %v341_v42 = vmul.f32 %v5994_v26, %v327_v34  ;;  %v342_v43 = vmul.f32 %v5997_v27, %v326_v33  ;;  %v5530_v29 = vld [vmem:[%s7126_s5 + $0xe] sm:$0x3] }
  0x9e   : > { %5537 = vmatpush1.msk.msra.mxu1 %vm521_vm3, %v6001_v31 }
  0x9f   : > { %v317_v45 = vadd.f32 %v315_v22, %v291_v39  ;;  %v318_v46 = vadd.f32 %v316_v23, %v292_v40  ;;  %v350_v47 = vpop.permute.xlu1 %349  ;;  %v348_v48 = vpop.permute.xlu0 %347  ;;  %5538 = vmatmul.mubr.msk.f32.vlgmr.msra.gmra.mxu1 %vm517_vm5, %v5535_v38  ;;  %v6050_v54 = vmax.f32 %v292_v40, 0.0  ;;  %v6052_v55 = vmax.f32 %v291_v39, 0.0  ;;  %v5539_v23 = vld [vmem:[%s7123_s2 + $0x8] sm:$0xf]  ;;  %v5547_v40 = vld [vmem:[%s7123_s2 + $0x10] sm:$0xf] }
  0xa0   : > { %v352_v52 = vsel %vm351_vm4, %v348_v48, %v350_v47  ;;  %v353_v53 = vsel %vm351_vm4, %v350_v47, %v348_v48  ;;  %853 = vmatprep.mubr.f32.mxu1 %v7128_v3  ;;  %v6060_v61 = vmax.f32 %v341_v42, 0.0  ;;  %v6062_v62 = vmax.f32 %v342_v43, 0.0  ;;  %v5551_v47 = vld [vmem:[%s7123_s2 + $0x14] sm:$0xf]  ;;  %v5531_v48 = vld [vmem:[%s7126_s5 + $0x10] sm:$0x3] }
  0xa1   : > { %v343_v56 = vadd.f32 %v341_v42, %v317_v45  ;;  %v344_v57 = vadd.f32 %v342_v43, %v318_v46  ;;  %v367_v58 = vmul.f32 %v6005_v32, %v353_v53  ;;  %v368_v59 = vmul.f32 %v6026_v41, %v352_v52  ;;  %5532 = vmatprep.subr.msk.mxu0 %vm521_vm3, %v6050_v54 }
  0xa2   : > { %5533 = vmatpush1.msk.msra.mxu0 %vm521_vm3, %v6052_v55  ;;  %v6126_v42 = vrot.slane %v5530_v29, %v5955_v8  ;;  %v6136_v46 = vrot.slane %v5530_v29, %v5958_v9 }
  0xa3   : > { %v369_v4 = vadd.f32 %v367_v58, %v343_v56  ;;  %v370_v5 = vadd.f32 %v368_v59, %v344_v57  ;;  %v6073_v10 = vmax.f32 %v367_v58, 0.0  ;;  %v6075_v11 = vmax.f32 %v368_v59, 0.0  ;;  %v379_v12 = vpop.permute.xlu1 %378  ;;  %v377_v15 = vpop.permute.xlu0 %376  ;;  %5534 = vmatmul.mubr.msk.f32.vlgmr.msra.gmra.mxu0 %vm517_vm5, %v516_v60  ;;  %5540 = vmatprep.subr.msk.mxu0 %vm521_vm3, %v6062_v62 }
  0xa4   : > { %v381_v16 = vsel %vm380_vm6, %v377_v15, %v379_v12  ;;  %v382_v17 = vsel %vm380_vm6, %v379_v12, %v377_v15  ;;  %5541 = vmatpush1.msk.msra.mxu0 %vm521_vm3, %v6060_v61  ;;  %766 = vmatprep.mubr.f32.mxu0 %v7128_v3  ;;  %7173 = vst [vmem:[#allocation15_spill] sm:$0xff] %v6126_v42  ;;  %7174 = vst [vmem:[#allocation16_spill] sm:$0xff] %v6136_v46  ;;  %v5555_v15 = vld [vmem:[%s7123_s2 + $0x18] sm:$0xf] }
  0xa5   : > { %v373_v19 = vadd.f32 %v369_v4, %v5907_v1  ;;  %v374_v20 = vadd.f32 %v370_v5, %v5915_v2  ;;  %v396_v21 = vmul.f32 %v6037_v49, %v381_v16  ;;  %v397_v22 = vmul.f32 %v6040_v50, %v382_v17  ;;  %5544 = vmatprep.subr.msk.mxu1 %vm521_vm3, %v6075_v11  ;;  %v483_v17 = vld [vmem:[%s7125_s4] sm:$0x3] }
  0xa6   : > { %5545 = vmatpush1.msk.msra.mxu1 %vm521_vm3, %v6073_v10  ;;  %5548 = vmatprep.subr.msk.mxu0 %vm521_vm3, %v6071_v0  ;;  %v6159_v4 = vrot.slane %v5531_v48, %v5955_v8  ;;  %v6171_v16 = vrot.slane %v5531_v48, %v5958_v9 }
  0xa7   : > { %v398_v2 = vadd.f32 %v396_v21, %v373_v19  ;;  %v399_v33 = vadd.f32 %v397_v22, %v374_v20  ;;  %v6108_v34 = vmax.f32 %v396_v21, 0.0  ;;  %v6110_v35 = vmax.f32 %v397_v22, 0.0  ;;  %v405_v36 = vpop.permute.xlu1 %404  ;;  %v403_v37 = vpop.permute.xlu0 %402  ;;  %5542 = vmatmul.mubr.msk.f32.vlgmr.msra.gmra.mxu0 %vm517_vm5, %v5539_v23  ;;  %5546 = vmatmul.mubr.msk.f32.vlgmr.msra.gmra.mxu1 %vm517_vm5, %v5543_v28  ;;  %v5568_v19 = vld [vmem:[%s7125_s4 + $0x2] sm:$0x3] }
  0xa8   : > { %v407_v38 = vsel %vm406_vm7, %v403_v37, %v405_v36  ;;  %v408_v39 = vsel %vm406_vm7, %v405_v36, %v403_v37  ;;  %5549 = vmatpush1.msk.msra.mxu0 %vm521_vm3, %v6034_v44  ;;  %940 = vmatprep.mubr.f32.mxu0 %v7128_v3  ;;  %v5559_v37 = vld [vmem:[%s7123_s2 + $0x1c] sm:$0xf] }
  0xa9   : > { %v422_v43 = vmul.f32 %v6067_v63, %v407_v38  ;;  %v423_v45 = vmul.f32 %v6088_v18, %v408_v39  ;;  %5552 = vmatprep.subr.msk.mxu1 %vm521_vm3, %v6110_v35  ;;  %1027 = vmatprep.mubr.f32.mxu1 %v7128_v3  ;;  %v488_v38 = vrot.slane %v483_v17, %v5955_v8 }
  0xaa   : > { %5553 = vmatpush1.msk.msra.mxu1 %vm521_vm3, %v6108_v34  ;;  %v492_v39 = vrot.slane %v483_v17, %v5958_v9 }
  0xab   : > { %v424_v51 = vadd.f32 %v422_v43, %v398_v2  ;;  %v425_v52 = vadd.f32 %v423_v45, %v399_v33  ;;  %v6147_v53 = vmax.f32 %v422_v43, 0.0  ;;  %v6149_v56 = vmax.f32 %v423_v45, 0.0  ;;  %v431_v57 = vpop.permute.xlu1 %430  ;;  %v429_v58 = vpop.permute.xlu0 %428  ;;  %5550 = vmatmul.mubr.msk.f32.vlgmr.msra.gmra.mxu0 %vm517_vm5, %v5547_v40  ;;  %5554 = vmatmul.mubr.msk.f32.vlgmr.msra.gmra.mxu1 %vm517_vm5, %v5551_v47  ;;  %v5607_v2 = vld [vmem:[%s7125_s4 + $0x6] sm:$0x3] }
  0xac   : > { %v433_v59 = vsel %vm432_vm8, %v429_v58, %v431_v57  ;;  %v434_v60 = vsel %vm432_vm8, %v431_v57, %v429_v58  ;;  %1114 = vmatprep.mubr.f32.mxu0 %v7128_v3  ;;  %1201 = vmatprep.mubr.f32.mxu1 %v7128_v3  ;;  %v1309_v45 = vrot.slane %v5568_v19, %v5955_v8 }
  0xad   : > { %v448_v5 = vmul.f32 %v6126_v42, %v433_v59  ;;  %v449_v12 = vmul.f32 %v6136_v46, %v434_v60  ;;  %5556 = vmatprep.subr.msk.mxu0 %vm521_vm3, %v6149_v56  ;;  %v1313_v47 = vrot.slane %v5568_v19, %v5958_v9  ;;  %v2076_v48 = vrot.slane %v5607_v2, %v5955_v8  ;;  %v5563_v60 = vld [vmem:[%s7123_s2 + $0x20] sm:$0xf] }
  0xae   : > { %5557 = vmatpush1.msk.msra.mxu0 %vm521_vm3, %v6147_v53 }
  0xaf   : > { %v450_v20 = vadd.f32 %v448_v5, %v424_v51  ;;  %v451_v21 = vadd.f32 %v449_v12, %v425_v52  ;;  %v6182_v22 = vmax.f32 %v448_v5, 0.0  ;;  %v6184_v23 = vmax.f32 %v449_v12, 0.0  ;;  %v457_v28 = vpop.permute.xlu1 %456  ;;  %v455_v29 = vpop.permute.xlu0 %454  ;;  %5558 = vmatmul.mubr.msk.f32.vlgmr.msra.gmra.mxu0 %vm517_vm5, %v5555_v15  ;;  %v5570_v5 = vld [vmem:[%s7123_s2 + $0x24] sm:$0xf] }
  0xb0   : > { %v459_v33 = vsel %vm458_vm9, %v455_v29, %v457_v28  ;;  %v460_v36 = vsel %vm458_vm9, %v457_v28, %v455_v29  ;;  %1288 = vmatprep.mubr.f32.mxu0 %v7128_v3  ;;  %v2080_v51 = vrot.slane %v5607_v2, %v5958_v9  ;;  %v5574_v29 = vld [vmem:[%s7123_s2 + $0x28] sm:$0xf] }
  0xb1   : > { %v474_v40 = vmul.f32 %v6159_v4, %v459_v33  ;;  %v475_v43 = vmul.f32 %v6171_v16, %v460_v36  ;;  %5560 = vmatprep.subr.msk.mxu1 %vm521_vm3, %v6184_v23  ;;  %v5578_v36 = vld [vmem:[%s7123_s2 + $0x2c] sm:$0xf] }
  0xb2   : > { %5561 = vmatpush1.msk.msra.mxu1 %vm521_vm3, %v6182_v22 }
  0xb3   : > { %v476_v52 = vadd.f32 %v474_v40, %v450_v20  ;;  %v477_v57 = vadd.f32 %v475_v43, %v451_v21  ;;  %v6210_v58 = vmax.f32 %v474_v40, 0.0  ;;  %v6212_v59 = vmax.f32 %v475_v43, 0.0  ;;  %5562 = vmatmul.mubr.msk.f32.vlgmr.msra.gmra.mxu1 %vm517_vm5, %v5559_v37  ;;  %5571 = vmatprep.subr.msk.mxu1 %vm521_vm3, %v6050_v54  ;;  %v5582_v37 = vld [vmem:[%s7123_s2 + $0x30] sm:$0xf]  ;;  %v5594_v40 = vld [vmem:[%s7123_s2 + $0x3c] sm:$0xf] }
  0xb4   : > { %5572 = vmatpush1.msk.msra.mxu1 %vm521_vm3, %v6052_v55  ;;  %1407 = vmatprep.mubr.f32.mxu1 %v7128_v3  ;;  %v5598_v43 = vld [vmem:[%s7123_s2 + $0x40] sm:$0xf] }
  0xb5   : > { %5564 = vmatprep.subr.msk.mxu0 %vm521_vm3, %v6212_v59  ;;  %5579 = vmatprep.subr.msk.mxu1 %vm521_vm3, %v6062_v62  ;;  %v6230_v12 = vmul.f32 %v488_v38, %v476_v52  ;;  %v6232_v15 = vmul.f32 %v492_v39, %v477_v57  ;;  %v6234_v17 = vmul.f32 %v1309_v45, %v476_v52  ;;  %v5586_v38 = vld [vmem:[%s7123_s2 + $0x34] sm:$0xf]  ;;  %v5590_v39 = vld [vmem:[%s7123_s2 + $0x38] sm:$0xf]  ;;  %v5602_v45 = vld [vmem:[%s7123_s2 + $0x44] sm:$0xf] }
  0xb6   : > { %5565 = vmatpush1.msk.msra.mxu0 %vm521_vm3, %v6210_v58  ;;  %v6238_v19 = vmul.f32 %v1313_v47, %v477_v57  ;;  %v6240_v20 = vmul.f32 %v2076_v48, %v476_v52  ;;  %v6242_v21 = vmul.f32 %v2080_v51, %v477_v57 }
  0xb7   : > { %5566 = vmatmul.mubr.msk.f32.vlgmr.msra.gmra.mxu0 %vm517_vm5, %v5563_v60  ;;  %5573 = vmatmul.mubr.msk.f32.vlgmr.msra.gmra.mxu1 %vm517_vm5, %v5570_v5  ;;  %v499_v28 = vcombine.low %v6230_v12, %v6232_v15 }
  0xb8   : > { %7175 = vst [vmem:[#allocation17_spill] sm:$0xff] %v6240_v20  ;;  %7176 = vst [vmem:[#allocation18_spill] sm:$0xff] %v6242_v21  ;;  %5575 = vmatprep.subr.msk.mxu0 %vm521_vm3, %v5999_v30  ;;  %5580 = vmatpush1.msk.msra.mxu1 %vm521_vm3, %v6060_v61 }
  0xb9   : > { %5576 = vmatpush1.msk.msra.mxu0 %vm521_vm3, %v6001_v31  ;;  %1488 = vmatprep.mubr.f32.mxu0 %v7128_v3 }
  0xba   : > { %5583 = vmatprep.subr.msk.mxu0 %vm521_vm3, %v6075_v11  ;;  %1569 = vmatprep.mubr.f32.mxu1 %v7128_v3 }
  0xbb   : > { %5587 = vmatprep.subr.msk.mxu1 %vm521_vm3, %v6071_v0  ;;  %5577 = vmatmul.mubr.msk.f32.vlgmr.msra.gmra.mxu0 %vm517_vm5, %v5574_v29 }
  0xbc   : > { %5581 = vmatmul.mubr.msk.f32.vlgmr.msra.gmra.mxu1 %vm517_vm5, %v5578_v36  ;;  %5584 = vmatpush1.msk.msra.mxu0 %vm521_vm3, %v6073_v10 }
  0xbd   : > { %5588 = vmatpush1.msk.msra.mxu1 %vm521_vm3, %v6034_v44  ;;  %5591 = vmatprep.subr.msk.mxu0 %vm521_vm3, %v6110_v35 }
  0xbe   : > { %5595 = vmatprep.subr.msk.mxu1 %vm521_vm3, %v6149_v56  ;;  %1650 = vmatprep.mubr.f32.mxu0 %v7128_v3 }
  0xbf   : > { %1731 = vmatprep.mubr.f32.mxu1 %v7128_v3  ;;  %5585 = vmatmul.mubr.msk.f32.vlgmr.msra.gmra.mxu0 %vm517_vm5, %v5582_v37 }
  0xc0   : > { %5589 = vmatmul.mubr.msk.f32.vlgmr.msra.gmra.mxu1 %vm517_vm5, %v5586_v38  ;;  %5592 = vmatpush1.msk.msra.mxu0 %vm521_vm3, %v6108_v34 }
  0xc1   : > { %5596 = vmatpush1.msk.msra.mxu1 %vm521_vm3, %v6147_v53  ;;  %5599 = vmatprep.subr.msk.mxu0 %vm521_vm3, %v6184_v23 }
  0xc2   : > { %5603 = vmatprep.subr.msk.mxu1 %vm521_vm3, %v6212_v59  ;;  %1812 = vmatprep.mubr.f32.mxu0 %v7128_v3 }
  0xc3   : > { %1893 = vmatprep.mubr.f32.mxu1 %v7128_v3  ;;  %5593 = vmatmul.mubr.msk.f32.vlgmr.msra.gmra.mxu0 %vm517_vm5, %v5590_v39 }
  0xc4   : > { %5597 = vmatmul.mubr.msk.f32.vlgmr.msra.gmra.mxu1 %vm517_vm5, %v5594_v40  ;;  %5600 = vmatpush1.msk.msra.mxu0 %vm521_vm3, %v6182_v22 }
  0xc5   : > { %5604 = vmatpush1.msk.msra.mxu1 %vm521_vm3, %v6210_v58  ;;  %5610 = vmatprep.subr.msk.mxu0 %vm521_vm3, %v6050_v54  ;;  %v5609_v54 = vld [vmem:[%s7123_s2 + $0x6c] sm:$0xf] }
  0xc6   : > { %5614 = vmatprep.subr.msk.mxu1 %vm521_vm3, %v5999_v30  ;;  %1974 = vmatprep.mubr.f32.mxu0 %v7128_v3  ;;  %v5613_v30 = vld [vmem:[%s7123_s2 + $0x70] sm:$0xf] }
  0xc7   : > { %2055 = vmatprep.mubr.f32.mxu1 %v7128_v3  ;;  %5601 = vmatmul.mubr.msk.f32.vlgmr.msra.gmra.mxu0 %vm517_vm5, %v5598_v43 }
  0xc8   : > { %5605 = vmatmul.mubr.msk.f32.vlgmr.msra.gmra.mxu1 %vm517_vm5, %v5602_v45  ;;  %5611 = vmatpush1.msk.msra.mxu0 %vm521_vm3, %v6052_v55  ;;  %v5621_v55 = vld [vmem:[%s7123_s2 + $0x78] sm:$0xf] }
  0xc9   : > { %5615 = vmatpush1.msk.msra.mxu1 %vm521_vm3, %v6001_v31  ;;  %5618 = vmatprep.subr.msk.mxu0 %vm521_vm3, %v6062_v62  ;;  %v5617_v31 = vld [vmem:[%s7123_s2 + $0x74] sm:$0xf]  ;;  %v5629_v62 = vld [vmem:[%s7123_s2 + $0x80] sm:$0xf] }
  0xca   : > { %5622 = vmatprep.subr.msk.mxu1 %vm521_vm3, %v6075_v11  ;;  %2174 = vmatprep.mubr.f32.mxu0 %v7128_v3 }
  0xcb   : > { %2255 = vmatprep.mubr.f32.mxu1 %v7128_v3  ;;  %5612 = vmatmul.mubr.msk.f32.vlgmr.msra.gmra.mxu0 %vm517_vm5, %v5609_v54 }
  0xcc   : > { %5616 = vmatmul.mubr.msk.f32.vlgmr.msra.gmra.mxu1 %vm517_vm5, %v5613_v30  ;;  %5619 = vmatpush1.msk.msra.mxu0 %vm521_vm3, %v6060_v61  ;;  %v5625_v61 = vld [vmem:[%s7123_s2 + $0x7c] sm:$0xf] }
  0xcd   : > { %5623 = vmatpush1.msk.msra.mxu1 %vm521_vm3, %v6073_v10  ;;  %2336 = vmatprep.mubr.f32.mxu0 %v7128_v3 }
  0xce   : > { %5630 = vmatprep.subr.msk.mxu1 %vm521_vm3, %v6110_v35  ;;  %2417 = vmatprep.mubr.f32.mxu1 %v7128_v3 }
  0xcf   : > { %5626 = vmatprep.subr.msk.mxu0 %vm521_vm3, %v6071_v0  ;;  %5620 = vmatmul.mubr.msk.f32.vlgmr.msra.gmra.mxu0 %vm517_vm5, %v5617_v31  ;;  %v5838_v0 = vmov 839922192  }
  0xd0   : > { %5624 = vmatmul.mubr.msk.f32.vlgmr.msra.gmra.mxu1 %vm517_vm5, %v5621_v55  ;;  %5627 = vmatpush1.msk.msra.mxu0 %vm521_vm3, %v6034_v44  ;;  %v5633_v44 = vld [vmem:[%s7123_s2 + $0x84] sm:$0xf]  ;;  %v508_v10 = vunpack.c.l.s4 %v5838_v0 }
  0xd1   : > { %5631 = vmatpush1.msk.msra.mxu1 %vm521_vm3, %v6108_v34  ;;  %5634 = vmatprep.subr.msk.mxu0 %vm521_vm3, %v6149_v56  ;;  %v481_v34 = vstv %s480_s19 }
  0xd2   : > { %5638 = vmatprep.subr.msk.mxu1 %vm521_vm3, %v6184_v23  ;;  %2498 = vmatprep.mubr.f32.mxu0 %v7128_v3  ;;  %v509_v11 = vunpack.c.0.s8 %v508_v10 }
  0xd3   : > { %2579 = vmatprep.mubr.f32.mxu1 %v7128_v3  ;;  %5628 = vmatmul.mubr.msk.f32.vlgmr.msra.gmra.mxu0 %vm517_vm5, %v5625_v61 }
  0xd4   : > { %5632 = vmatmul.mubr.msk.f32.vlgmr.msra.gmra.mxu1 %vm517_vm5, %v5629_v62  ;;  %5635 = vmatpush1.msk.msra.mxu0 %vm521_vm3, %v6147_v53  ;;  %v6396_v35 = vsub.s32 %v509_v11, %v5950_v6  ;;  %v506_v53 = vpop.permute.xlu0 %505 }
  0xd5   : > { %5639 = vmatpush1.msk.msra.mxu1 %vm521_vm3, %v6182_v22  ;;  %5642 = vmatprep.subr.msk.mxu0 %vm521_vm3, %v6212_v59  ;;  %v482_v22 = vmul.f32 %v481_v34, %v5907_v1 }
  0xd6   : > { %2660 = vmatprep.mubr.f32.mxu0 %v7128_v3  ;;  %2741 = vmatprep.mubr.f32.mxu1 %v7128_v3  ;;  %v513_v23 = vrot.slane %v506_v53, %v6396_v35  ;;  %v5637_v53 = vld [vmem:[%s7123_s2 + $0x88] sm:$0xf] }
  0xd7   : > { %5636 = vmatmul.mubr.msk.f32.vlgmr.msra.gmra.mxu0 %vm517_vm5, %v5633_v44  ;;  %v501_v51 = vadd.f32 %v499_v28, %v482_v22 }
  0xd8   : > { %5643 = vmatpush1.msk.msra.mxu0 %vm521_vm3, %v6210_v58  ;;  %2822 = vmatprep.mubr.f32.mxu0 %v7128_v3 }
  0xd9   : > { %v515_v57 = vadd.f32 %v513_v23, %v501_v51  ;;  %5640 = vmatmul.mubr.msk.f32.vlgmr.msra.gmra.mxu1 %vm517_vm5, %v5637_v53 }
  0xda   : > { %3047 = vmatprep.mubr.f32.mxu1 %v7128_v3 }
 0x15f   : > { %v681_v56 = vpop.f32.mrf.mxu1 }
 0x161   : > { %v683_v48 = vpop.f32.mrf.mxu1 }
 0x162   : > { %v688_v59 = vcombine.low %v681_v56, %v683_v48  ;;  %v5641_v48 = vld [vmem:[%s7123_s2 + $0x8c] sm:$0xf] }
 0x163   : > { %v594_v47 = vpop.f32.mrf.mxu0  ;;  %5644 = vmatmul.mubr.msk.f32.vlgmr.msra.gmra.mxu0 %vm517_vm5, %v5641_v48 }
 0x164   : > { %3134 = vmatprep.mubr.f32.mxu0 %v7128_v3 }
 0x165   : > { %v596_v52 = vpop.f32.mrf.mxu0 }
 0x166   : > { %v601_v58 = vcombine.low %v594_v47, %v596_v52 }
 0x167   : > { %v768_v60 = vpop.f32.mrf.mxu0  ;;  %v855_v5 = vpop.f32.mrf.mxu1 }
 0x168   : > { %v603_v6 = vadd.f32 %v601_v58, %v515_v57  ;;  %v5569_v57 = vld [vmem:[%s7124_s3 + $0x4] sm:$0xf] }
 0x169   : > { %v770_v29 = vpop.f32.mrf.mxu0  ;;  %v857_v36 = vpop.f32.mrf.mxu1 }
 0x16a   : > { %v690_v37 = vadd.f32 %v688_v59, %v603_v6  ;;  %v775_v38 = vcombine.low %v768_v60, %v770_v29  ;;  %v862_v1 = vcombine.low %v855_v5, %v857_v36  ;;  %v5647_v36 = vld [vmem:[%s7124_s3 + $0x8] sm:$0xf] }
 0x16b   : > { %v942_v39 = vpop.f32.mrf.mxu0  ;;  %v1029_v40 = vpop.f32.mrf.mxu1 }
 0x16c   : > { %v777_v43 = vadd.f32 %v775_v38, %v690_v37 }
 0x16d   : > { %v944_v45 = vpop.f32.mrf.mxu0  ;;  %v1031_v54 = vpop.f32.mrf.mxu1 }
 0x16e   : > { %v864_v30 = vadd.f32 %v862_v1, %v777_v43  ;;  %v949_v12 = vcombine.low %v942_v39, %v944_v45  ;;  %v1036_v15 = vcombine.low %v1029_v40, %v1031_v54 }
 0x16f   : > { %v1116_v28 = vpop.f32.mrf.mxu0 }
 0x170   : > { %v951_v31 = vadd.f32 %v949_v12, %v864_v30 }
 0x171   : > { %v1118_v55 = vpop.f32.mrf.mxu0 }
 0x172   : > { %v1038_v62 = vadd.f32 %v1036_v15, %v951_v31  ;;  %v1123_v44 = vcombine.low %v1116_v28, %v1118_v55 }
 0x173   : > { %v1203_v61 = vpop.f32.mrf.mxu1 }
 0x174   : > { %v1125_v34 = vadd.f32 %v1123_v44, %v1038_v62 }
 0x175   : > { %v1205_v0 = vpop.f32.mrf.mxu1 }
 0x176   : > { %v1210_v10 = vcombine.low %v1203_v61, %v1205_v0 }
 0x177   : > { %v1290_v11 = vpop.f32.mrf.mxu0  ;;  %v6447_v52 = vpop.f32.mrf.mxu1 }
 0x178   : > { %v1212_v22 = vadd.f32 %v1210_v10, %v1125_v34 }
 0x179   : > { %v1292_v56 = vpop.f32.mrf.mxu0  ;;  %v6452_v58 = vpop.f32.mrf.mxu1 }
 0x17a   : > { %v1297_v23 = vcombine.low %v1290_v11, %v1292_v56 }
 0x17b   : > { %v6454_v59 = vpop.f32.mrf.mxu0 }
 0x17c   : > { %v6408_v47 = vadd.f32 %v1297_v23, %v1212_v22  ;;  %v6460_v5 = vpop.f32.mrf.mxu1 }
 0x17d   : > { %v6458_v60 = vpop.f32.mrf.mxu0 }
 0x17e   : > { %2847 = vrot.lane.b32.xlu0 %v6408_v47, %s5829_s9  ;;  %2837 = vrot.lane.b32.xlu1 %v6408_v47, %s5830_s10  ;;  %v6421_v51 = vcombine.high %v6408_v47, %v6408_v47  ;;  %v6462_v6 = vpop.f32.mrf.mxu1 }
 0x17f   : > { %v6464_v29 = vpop.f32.mrf.mxu0 }
 0x180   : > { %v6473_v38 = vpop.f32.mrf.mxu1 }
 0x181   : > { %v6471_v37 = vpop.f32.mrf.mxu0 }
 0x182   : > { %2859 = vrot.lane.b32.xlu0 %v6408_v47, %s5832_s11  ;;  %2839 = vrot.lane.b32.xlu1 %v6421_v51, %s5830_s10  ;;  %v6475_v1 = vpop.f32.mrf.mxu1 }
 0x183   : > { %v6477_v39 = vpop.f32.mrf.mxu0 }
 0x184   : > { %v6481_v43 = vpop.f32.mrf.mxu1 }
 0x185   : > { %v6479_v40 = vpop.f32.mrf.mxu0 }
 0x186   : > { %2871 = vrot.lane.b32.xlu0 %v6408_v47, %s5833_s12  ;;  %2849 = vrot.lane.b32.xlu1 %v6421_v51, %s5829_s9  ;;  %v6483_v45 = vpop.f32.mrf.mxu1 }
 0x187   : > { %v6485_v54 = vpop.f32.mrf.mxu0 }
 0x188   : > { %v6487_v30 = vpop.f32.mrf.mxu1 }
 0x189   : > { %v6489_v12 = vpop.f32.mrf.mxu0 }
 0x18a   : > { %2886 = vrot.lane.b32.xlu0 %v6408_v47, %s5834_s13  ;;  %2861 = vrot.lane.b32.xlu1 %v6421_v51, %s5832_s11  ;;  %v6491_v15 = vpop.f32.mrf.mxu1 }
 0x18b   : > { %v6493_v28 = vpop.f32.mrf.mxu0 }
 0x18c   : > { %7177 = vst [vmem:[#allocation19_spill] sm:$0xff] %v6493_v28  ;;  %v6495_v31 = vpop.f32.mrf.mxu1 }
 0x18d   : > { %7178 = vst [vmem:[#allocation20_spill] sm:$0xff] %v6495_v31  ;;  %v6497_v55 = vpop.f32.mrf.mxu0  ;;  %v6579_v31 = vmax.f32 %v6408_v47, 0.0 }
 0x18e   : > { %2898 = vrot.lane.b32.xlu0 %v6408_v47, %s5835_s14  ;;  %2873 = vrot.lane.b32.xlu1 %v6421_v51, %s5833_s12  ;;  %7179 = vst [vmem:[#allocation21_spill] sm:$0xff] %v6497_v55  ;;  %v6499_v61 = vpop.f32.mrf.mxu1 }
 0x18f   : > { %7180 = vst [vmem:[#allocation22_spill] sm:$0xff] %v6499_v61  ;;  %v6505_v0 = vpop.f32.mrf.mxu0 }
 0x190   : > { %7181 = vst [vmem:[#allocation23_spill] sm:$0xff] %v6505_v0  ;;  %v6507_v10 = vpop.f32.mrf.mxu1  ;;  %v7187_v0 = vmov 0.0  }
 0x191   : > { %7182 = vst [vmem:[#allocation24_spill] sm:$0xff] %v6507_v10  ;;  %v6509_v11 = vpop.f32.mrf.mxu0 }
 0x192   : > { %2910 = vrot.lane.b32.xlu0 %v6408_v47, %s5836_s15  ;;  %2888 = vrot.lane.b32.xlu1 %v6421_v51, %s5834_s13  ;;  %7183 = vst [vmem:[#allocation25_spill] sm:$0xff] %v6509_v11  ;;  %v6511_v34 = vpop.f32.mrf.mxu1 }
 0x193   : > { %7184 = vst [vmem:[#allocation26_spill] sm:$0xff] %v6511_v34  ;;  %v6517_v22 = vpop.f32.mrf.mxu0 }
 0x194   : > { %7185 = vst [vmem:[#allocation27_spill] sm:$0xff] %v6517_v22 }
 0x195   : > { %v6519_v23 = vpop.f32.mrf.mxu0 }
 0x196   : > { %2922 = vrot.lane.b32.xlu0 %v6408_v47, %s5837_s16  ;;  %2900 = vrot.lane.b32.xlu1 %v6421_v51, %s5835_s14  ;;  %7186 = vst [vmem:[#allocation28_spill] sm:$0xff] %v6519_v23 }
 0x19a   : > { %1327 = vperm.xlu0 %5796, %v5569_v57   ;;  %2912 = vrot.lane.b32.xlu1 %v6421_v51, %s5836_s15 }
 0x19e   : > { %2924 = vrot.lane.b32.xlu1 %v6421_v51, %s5837_s16 }
 0x1a2   : > { %2961 = vperm.xlu1 %5797, %v5647_v36  }
 0x1f0   : > { %v2848_v57 = vpop.permute.xlu0 %2847  ;;  %v2838_v36 = vpop.permute.xlu1 %2837 }
 0x1f4   : > { %v2860_v44 = vpop.permute.xlu0 %2859  ;;  %v2840_v62 = vpop.permute.xlu1 %2839 }
 0x1f5   : > { %v2841_v33 = vsel %vm276_vm2, %v2838_v36, %v2840_v62  ;;  %v2842_v53 = vsel %vm276_vm2, %v2840_v62, %v2838_v36  ;;  %v5648_v62 = vld [vmem:[%s7123_s2 + $0x48] sm:$0xf] }
 0x1f6   : > { %v6528_v2 = vmul.f32 %v2842_v53, %v5988_v24  ;;  %v6531_v56 = vmul.f32 %v2841_v33, %v5991_v25 }
 0x1f8   : > { %v7136_v3 = vmax.f32 %v6528_v2, 0.0  ;;  %v7134_v48 = vmax.f32 %v6531_v56, 0.0  ;;  %v2872_v23 = vpop.permute.xlu0 %2871  ;;  %v2850_v22 = vpop.permute.xlu1 %2849 }
 0x1f9   : > { %v2851_v34 = vsel %vm299_vm0, %v2848_v57, %v2850_v22  ;;  %v2852_v10 = vsel %vm299_vm0, %v2850_v22, %v2848_v57 }
 0x1fa   : > { %v6543_v53 = vmul.f32 %v2852_v10, %v5965_v13  ;;  %v6546_v33 = vmul.f32 %v2851_v34, %v5968_v14  ;;  %5649 = vmatprep.subr.msk.mxu1 %vm521_vm3, %v7134_v48 }
 0x1fb   : > { %5650 = vmatpush1.msk.msra.mxu1 %vm521_vm3, %v7136_v3  ;;  %v5652_v3 = vld [vmem:[%s7123_s2 + $0x4c] sm:$0xf] }
 0x1fc   : > { %v2855_v22 = vadd.f32 %v6543_v53, %v6528_v2  ;;  %v2856_v57 = vadd.f32 %v6546_v33, %v6531_v56  ;;  %5651 = vmatmul.mubr.msk.f32.vlgmr.msra.gmra.mxu1 %vm517_vm5, %v5648_v62  ;;  %v2862_v34 = vpop.permute.xlu1 %2861  ;;  %v2887_v61 = vpop.permute.xlu0 %2886  ;;  %v7188_v62 = vmax.f32 %v6546_v33, 0.0 }
 0x1fd   : > { %v2863_v48 = vsel %vm325_vm1, %v2860_v44, %v2862_v34  ;;  %v2864_v11 = vsel %vm325_vm1, %v2862_v34, %v2860_v44  ;;  %3221 = vmatprep.mubr.f32.mxu1 %v7187_v0  ;;  %v7189_v44 = vmax.f32 %v6543_v53, 0.0 }
 0x1fe   : > { %v6570_v10 = vmul.f32 %v2864_v11, %v5994_v26  ;;  %v6573_v36 = vmul.f32 %v2863_v48, %v5997_v27  ;;  %5653 = vmatprep.subr.msk.mxu0 %vm521_vm3, %v7188_v62 }
 0x1ff   : > { %5654 = vmatpush1.msk.msra.mxu0 %vm521_vm3, %v7189_v44  ;;  %v5656_v44 = vld [vmem:[%s7123_s2 + $0x50] sm:$0xf] }
 0x200   : > { %v2867_v34 = vadd.f32 %v6570_v10, %v2855_v22  ;;  %v2868_v55 = vadd.f32 %v6573_v36, %v2856_v57  ;;  %v7146_v11 = vmax.f32 %v6570_v10, 0.0  ;;  %v7144_v48 = vmax.f32 %v6573_v36, 0.0  ;;  %5655 = vmatmul.mubr.msk.f32.vlgmr.msra.gmra.mxu0 %vm517_vm5, %v5652_v3  ;;  %v2874_v28 = vpop.permute.xlu1 %2873 }
 0x201   : > { %v2875_v62 = vsel %vm351_vm4, %v2872_v23, %v2874_v28  ;;  %v2876_v21 = vsel %vm351_vm4, %v2874_v28, %v2872_v23  ;;  %3308 = vmatprep.mubr.f32.mxu0 %v7187_v0  ;;  %v6608_v3 = vcombine.high %v6579_v31, %v6579_v31  ;;  %v2899_v28 = vpop.permute.xlu0 %2898 }
 0x202   : > { %v6598_v22 = vmul.f32 %v2876_v21, %v6005_v32  ;;  %v6601_v57 = vmul.f32 %v2875_v62, %v6026_v41  ;;  %5657 = vmatprep.subr.msk.mxu1 %vm521_vm3, %v7144_v48 }
 0x203   : > { %5658 = vmatpush1.msk.msra.mxu1 %vm521_vm3, %v7146_v11 }
 0x204   : > { %v2879_v23 = vadd.f32 %v6598_v22, %v2867_v34  ;;  %v2880_v21 = vadd.f32 %v6601_v57, %v2868_v55  ;;  %5659 = vmatmul.mubr.msk.f32.vlgmr.msra.gmra.mxu1 %vm517_vm5, %v5656_v44  ;;  %5665 = vmatprep.subr.msk.mxu1 %vm521_vm3, %v6608_v3  ;;  %v2889_v48 = vpop.permute.xlu1 %2888  ;;  %v5660_v55 = vld [vmem:[%s7123_s2 + $0x54] sm:$0xf]  ;;  %v5664_v34 = vld [vmem:[%s7123_s2 + $0x58] sm:$0xf]  ;;  %v7191_v32 = vmax.f32 %v6598_v22, 0.0 }
 0x205   : > { %v2890_v41 = vsel %vm380_vm6, %v2887_v61, %v2889_v48  ;;  %v2891_v11 = vsel %vm380_vm6, %v2889_v48, %v2887_v61  ;;  %5666 = vmatpush1.msk.msra.mxu1 %vm521_vm3, %v6579_v31  ;;  %3395 = vmatprep.mubr.f32.mxu1 %v7187_v0  ;;  %v7190_v48 = vmax.f32 %v6601_v57, 0.0 }
 0x206   : > { %v2883_v44 = vadd.f32 %v2879_v23, %v6408_v47  ;;  %v2884_v62 = vadd.f32 %v2880_v21, %v6421_v51  ;;  %v6636_v20 = vmul.f32 %v2890_v41, %v6037_v49  ;;  %v6639_v61 = vmul.f32 %v2891_v11, %v6040_v50 }
 0x207   : > { %5661 = vmatprep.subr.msk.mxu0 %vm521_vm3, %v7190_v48 }
 0x208   : > { %5662 = vmatpush1.msk.msra.mxu0 %vm521_vm3, %v7191_v32  ;;  %v2894_v27 = vadd.f32 %v6636_v20, %v2883_v44  ;;  %v2895_v23 = vadd.f32 %v6639_v61, %v2884_v62  ;;  %v7151_v51 = vmax.f32 %v6636_v20, 0.0  ;;  %v7150_v41 = vmax.f32 %v6639_v61, 0.0  ;;  %v2901_v11 = vpop.permute.xlu1 %2900  ;;  %5667 = vmatmul.mubr.msk.f32.vlgmr.msra.gmra.mxu1 %vm517_vm5, %v5664_v34  ;;  %v5668_v32 = vld [vmem:[%s7123_s2 + $0x5c] sm:$0xf]  ;;  %v2911_v62 = vpop.permute.xlu0 %2910 }
 0x209   : > { %5663 = vmatmul.mubr.msk.f32.vlgmr.msra.gmra.mxu0 %vm517_vm5, %v5660_v55  ;;  %v2902_v21 = vsel %vm406_vm7, %v2899_v28, %v2901_v11  ;;  %v2903_v48 = vsel %vm406_vm7, %v2901_v11, %v2899_v28  ;;  %3569 = vmatprep.mubr.f32.mxu1 %v7187_v0 }
 0x20a   : > { %3482 = vmatprep.mubr.f32.mxu0 %v7187_v0  ;;  %v6663_v55 = vmul.f32 %v2902_v21, %v6067_v63  ;;  %v6666_v34 = vmul.f32 %v2903_v48, %v6088_v18  ;;  %5669 = vmatprep.subr.msk.mxu0 %vm521_vm3, %v7150_v41 }
 0x20b   : > { %5670 = vmatpush1.msk.msra.mxu0 %vm521_vm3, %v7151_v51  ;;  %v5672_v51 = vld [vmem:[%s7123_s2 + $0x60] sm:$0xf] }
 0x20c   : > { %v2906_v28 = vadd.f32 %v6663_v55, %v2894_v27  ;;  %v2907_v44 = vadd.f32 %v6666_v34, %v2895_v23  ;;  %v7156_v11 = vmax.f32 %v6663_v55, 0.0  ;;  %v7153_v21 = vmax.f32 %v6666_v34, 0.0  ;;  %v2913_v48 = vpop.permute.xlu1 %2912 }
 0x20d   : > { %5671 = vmatmul.mubr.msk.f32.vlgmr.msra.gmra.mxu0 %vm517_vm5, %v5668_v32  ;;  %v2914_v18 = vsel %vm432_vm8, %v2911_v62, %v2913_v48  ;;  %v2915_v41 = vsel %vm432_vm8, %v2913_v48, %v2911_v62  ;;  %v5646_v32 = vld [vmem:[%s7125_s4 + $0x4] sm:$0x3]  ;;  %v2923_v62 = vpop.permute.xlu0 %2922 }
 0x20e   : > { %3656 = vmatprep.mubr.f32.mxu0 %v7187_v0  ;;  %v6688_v27 = vmul.f32 %v2914_v18, %v6126_v42  ;;  %v6691_v23 = vmul.f32 %v2915_v41, %v6136_v46  ;;  %5673 = vmatprep.subr.msk.mxu1 %vm521_vm3, %v7153_v21  ;;  %v5685_v18 = vld [vmem:[%s7125_s4 + $0x8] sm:$0x3]  ;;  %v2943_v63 = vrot.slane %v5646_v32, %v5955_v8 }
 0x20f   : > { %5674 = vmatpush1.msk.msra.mxu1 %vm521_vm3, %v7156_v11  ;;  %v2947_v11 = vrot.slane %v5646_v32, %v5958_v9 }
 0x210   : > { %v2918_v41 = vadd.f32 %v6688_v27, %v2906_v28  ;;  %v2919_v48 = vadd.f32 %v6691_v23, %v2907_v44  ;;  %v2920_v46 = vmax.f32 %v6688_v27, 0.0  ;;  %v2921_v21 = vmax.f32 %v6691_v23, 0.0  ;;  %5675 = vmatmul.mubr.msk.f32.vlgmr.msra.gmra.mxu1 %vm517_vm5, %v5672_v51  ;;  %v2925_v42 = vpop.permute.xlu1 %2924  ;;  %v5676_v28 = vld [vmem:[%s7123_s2 + $0x64] sm:$0xf] }
 0x211   : > { %v2926_v50 = vsel %vm458_vm9, %v2923_v62, %v2925_v42  ;;  %v2927_v49 = vsel %vm458_vm9, %v2925_v42, %v2923_v62  ;;  %3743 = vmatprep.mubr.f32.mxu1 %v7187_v0  ;;  %v3765_v44 = vrot.slane %v5685_v18, %v5955_v8  ;;  %v3769_v51 = vrot.slane %v5685_v18, %v5958_v9  ;;  %v5687_v18 = vld [vmem:[%s7123_s2 + $0x90] sm:$0xf] }
 0x212   : > { %v2928_v23 = vmul.f32 %v2926_v50, %v6159_v4  ;;  %v2929_v32 = vmul.f32 %v2927_v49, %v6171_v16  ;;  %5677 = vmatprep.subr.msk.mxu0 %vm521_vm3, %v2921_v21  ;;  %v7192_v8 = vmax.f32 %v6531_v56, 0.0  ;;  %v7193_v50 = vmax.f32 %v6528_v2, 0.0  ;;  %v5680_v49 = vld [vmem:[%s7123_s2 + $0x68] sm:$0xf] }
 0x213   : > { %5678 = vmatpush1.msk.msra.mxu0 %vm521_vm3, %v2920_v46  ;;  %v7194_v2 = vmax.f32 %v6573_v36, 0.0  ;;  %v7196_v36 = vmax.f32 %v6570_v10, 0.0  ;;  %v5699_v10 = vld [vmem:[%s7123_s2 + $0x9c] sm:$0xf] }
 0x214   : > { %v2930_v42 = vadd.f32 %v2928_v23, %v2918_v41  ;;  %v2931_v62 = vadd.f32 %v2929_v32, %v2919_v48  ;;  %v2932_v26 = vmax.f32 %v2928_v23, 0.0  ;;  %v2933_v14 = vmax.f32 %v2929_v32, 0.0  ;;  %5679 = vmatmul.mubr.msk.f32.vlgmr.msra.gmra.mxu0 %vm517_vm5, %v5676_v28  ;;  %5688 = vmatprep.subr.msk.mxu0 %vm521_vm3, %v7192_v8 }
 0x215   : > { %5689 = vmatpush1.msk.msra.mxu0 %vm521_vm3, %v7193_v50  ;;  %3863 = vmatprep.mubr.f32.mxu0 %v7187_v0  ;;  %v7195_v28 = vmax.f32 %v6546_v33, 0.0  ;;  %v5695_v33 = vld [vmem:[%s7123_s2 + $0x98] sm:$0xf]  ;;  %v7198_v23 = vmax.f32 %v6601_v57, 0.0  ;;  %v7200_v57 = vmax.f32 %v6639_v61, 0.0  ;;  %v7201_v32 = vmax.f32 %v6666_v34, 0.0 }
 0x216   : > { %v6742_v41 = vmul.f32 %v2943_v63, %v2930_v42  ;;  %v6744_v48 = vmul.f32 %v2947_v11, %v2931_v62  ;;  %v6746_v56 = vmul.f32 %v3765_v44, %v2930_v42  ;;  %v6748_v8 = vmul.f32 %v3769_v51, %v2931_v62  ;;  %5681 = vmatprep.subr.msk.mxu1 %vm521_vm3, %v2933_v14  ;;  %v5691_v44 = vld [vmem:[%s7123_s2 + $0x94] sm:$0xf]  ;;  %v5711_v34 = vld [vmem:[%s7123_s2 + $0xa8] sm:$0xf]  ;;  %v6847_v42 = vld [vmem:[%s5904_s8] sm:$0xff] }
 0x217   : > { %5696 = vmatprep.subr.msk.mxu0 %vm521_vm3, %v7194_v2  ;;  %5682 = vmatpush1.msk.msra.mxu1 %vm521_vm3, %v2932_v26  ;;  %v7197_v51 = vmax.f32 %v6543_v53, 0.0  ;;  %v7199_v53 = vmax.f32 %v6598_v22, 0.0  ;;  %v5707_v22 = vld [vmem:[%s7123_s2 + $0xa4] sm:$0xf]  ;;  %v7203_v61 = vmax.f32 %v6663_v55, 0.0  ;;  %v6842_v55 = vpop.f32.mrf.mxu0  ;;  %v7204_v2 = vcombine.low %v6234_v17, %v6238_v19 }
 0x218   : > { %5683 = vmatmul.mubr.msk.f32.vlgmr.msra.gmra.mxu1 %vm517_vm5, %v5680_v49  ;;  %5690 = vmatmul.mubr.msk.f32.vlgmr.msra.gmra.mxu0 %vm517_vm5, %v5687_v18  ;;  %v2954_v63 = vcombine.low %v6742_v41, %v6744_v48  ;;  %v3776_v11 = vcombine.low %v6746_v56, %v6748_v8  ;;  %v1821_v41 = vcombine.low %v6477_v39, %v6479_v40 }
 0x219   : > { %5692 = vmatprep.subr.msk.mxu1 %vm521_vm3, %v7195_v28  ;;  %5697 = vmatpush1.msk.msra.mxu0 %vm521_vm3, %v7196_v36  ;;  %v6850_v50 = vpop.f32.mrf.mxu0 }
 0x21a   : > { %5693 = vmatpush1.msk.msra.mxu1 %vm521_vm3, %v7197_v51  ;;  %5704 = vmatprep.subr.msk.mxu0 %vm521_vm3, %v6608_v3  ;;  %v5703_v3 = vld [vmem:[%s7123_s2 + $0xa0] sm:$0xf]  ;;  %v1416_v51 = vcombine.low %v6447_v52, %v6452_v58 }
 0x21b   : > { %5700 = vmatprep.subr.msk.mxu1 %vm521_vm3, %v7198_v23  ;;  %3944 = vmatprep.mubr.f32.mxu1 %v7187_v0 }
 0x21c   : > { %4025 = vmatprep.mubr.f32.mxu0 %v7187_v0  ;;  %5694 = vmatmul.mubr.msk.f32.vlgmr.msra.gmra.mxu1 %vm517_vm5, %v5691_v44 }
 0x21d   : > { %5698 = vmatmul.mubr.msk.f32.vlgmr.msra.gmra.mxu0 %vm517_vm5, %v5695_v33  ;;  %5701 = vmatpush1.msk.msra.mxu1 %vm521_vm3, %v7199_v53 }
 0x21e   : > { %5705 = vmatpush1.msk.msra.mxu0 %vm521_vm3, %v6579_v31  ;;  %5708 = vmatprep.subr.msk.mxu1 %vm521_vm3, %v7200_v57  ;;  %v7202_v31 = vmax.f32 %v6636_v20, 0.0  ;;  %v5719_v20 = vld [vmem:[%s7123_s2 + $0xb0] sm:$0xf] }
 0x21f   : > { %5712 = vmatprep.subr.msk.mxu0 %vm521_vm3, %v7201_v32  ;;  %4106 = vmatprep.mubr.f32.mxu1 %v7187_v0  ;;  %v2962_v32 = vpop.permute.xlu1 %2961 }
 0x220   : > { %4187 = vmatprep.mubr.f32.mxu0 %v7187_v0  ;;  %5702 = vmatmul.mubr.msk.f32.vlgmr.msra.gmra.mxu1 %vm517_vm5, %v5699_v10  ;;  %v1497_v10 = vcombine.low %v6454_v59, %v6458_v60  ;;  %v2969_v52 = vrot.slane %v2962_v32, %v6396_v35 }
 0x221   : > { %5706 = vmatmul.mubr.msk.f32.vlgmr.msra.gmra.mxu0 %vm517_vm5, %v5703_v3  ;;  %5709 = vmatpush1.msk.msra.mxu1 %vm521_vm3, %v7202_v31  ;;  %v2935_v3 = vstv %s5645_s23  ;;  %v1578_v31 = vcombine.low %v6460_v5, %v6462_v6  ;;  %s7026_s23 = sld [smem:[#allocation2 + $0x3]] }
 0x222   : > { %5713 = vmatpush1.msk.msra.mxu0 %vm521_vm3, %v7203_v61  ;;  %5716 = vmatprep.subr.msk.mxu1 %vm521_vm3, %v2921_v21  ;;  %v1328_v21 = vpop.permute.xlu0 %1327  ;;  %v2936_v61 = vmul.f32 %v2935_v3, %v6408_v47 }
 0x223   : > { %5720 = vmatprep.subr.msk.mxu0 %vm521_vm3, %v2933_v14  ;;  %4268 = vmatprep.mubr.f32.mxu1 %v7187_v0  ;;  %v5715_v14 = vld [vmem:[%s7123_s2 + $0xac] sm:$0xf]  ;;  %v1335_v49 = vrot.slane %v1328_v21, %v6396_v35  ;;  %v6858_v36 = vpop.f32.mrf.mxu0 }
 0x224   : > { %4349 = vmatprep.mubr.f32.mxu0 %v7187_v0  ;;  %5710 = vmatmul.mubr.msk.f32.vlgmr.msra.gmra.mxu1 %vm517_vm5, %v5707_v22  ;;  %v2956_v59 = vadd.f32 %v2954_v63, %v2936_v61 }
 0x225   : > { %5714 = vmatmul.mubr.msk.f32.vlgmr.msra.gmra.mxu0 %vm517_vm5, %v5711_v34  ;;  %5717 = vmatpush1.msk.msra.mxu1 %vm521_vm3, %v2920_v46  ;;  %v1301_v46 = vstv %s5567_s20  ;;  %v6864_v23 = vpop.f32.mrf.mxu0 }
 0x226   : > { %5721 = vmatpush1.msk.msra.mxu0 %vm521_vm3, %v2932_v26  ;;  %4430 = vmatprep.mubr.f32.mxu1 %v7187_v0  ;;  %v6840_v26 = vpop.f32.mrf.mxu1  ;;  %v1302_v62 = vmul.f32 %v6847_v42, %v1301_v46  ;;  %v2971_v21 = vadd.f32 %v2969_v52, %v2956_v59 }
 0x227   : > { %4511 = vmatprep.mubr.f32.mxu0 %v7187_v0 }
 0x228   : > { %5718 = vmatmul.mubr.msk.f32.vlgmr.msra.gmra.mxu1 %vm517_vm5, %v5715_v14  ;;  %v6844_v27 = vpop.f32.mrf.mxu1  ;;  %v1322_v28 = vadd.f32 %v7204_v2, %v1302_v62  ;;  %v1740_v2 = vcombine.low %v6473_v38, %v6475_v1  ;;  %v1902_v38 = vcombine.low %v6481_v43, %v6483_v45 }
 0x229   : > { %4737 = vmatprep.mubr.f32.mxu1 %v7187_v0  ;;  %5722 = vmatmul.mubr.msk.f32.vlgmr.msra.gmra.mxu0 %vm517_vm5, %v5719_v20  ;;  %v1659_v20 = vcombine.low %v6464_v29, %v6471_v37 }
 0x22a   : > { %4824 = vmatprep.mubr.f32.mxu0 %v7187_v0  ;;  %v6853_v18 = vpop.f32.mrf.mxu1  ;;  %v1337_v44 = vadd.f32 %v1335_v49, %v1322_v28 }
 0x22c   : > { %v6862_v33 = vpop.f32.mrf.mxu1  ;;  %v1418_v53 = vadd.f32 %v1416_v51, %v1337_v44 }
 0x22e   : > { %v1499_v19 = vadd.f32 %v1497_v10, %v1418_v53 }
 0x230   : > { %v1580_v14 = vadd.f32 %v1578_v31, %v1499_v19 }
 0x232   : > { %v1661_v49 = vadd.f32 %v1659_v20, %v1580_v14 }
 0x234   : > { %v1742_v3 = vadd.f32 %v1740_v2, %v1661_v49 }
 0x236   : > { %v1823_v19 = vadd.f32 %v1821_v41, %v1742_v3 }
 0x238   : > { %v1904_v52 = vadd.f32 %v1902_v38, %v1823_v19 }
 0x2bc   : > { %v3049_v57 = vpop.f32.mrf.mxu1 }
 0x2be   : > { %v3051_v22 = vpop.f32.mrf.mxu1 }
 0x2bf   : > { %v3056_v60 = vcombine.low %v3049_v57, %v3051_v22 }
 0x2c0   : > { %v3136_v17 = vpop.f32.mrf.mxu0 }
 0x2c1   : > { %v3058_v28 = vadd.f32 %v3056_v60, %v2971_v21  ;;  %v2064_v60 = vcombine.low %v6487_v30, %v6491_v15  ;;  %v5608_v30 = vld [vmem:[%s7124_s3 + $0xc] sm:$0xf]  ;;  %v5725_v15 = vld [vmem:[%s7124_s3 + $0x14] sm:$0xf] }
 0x2c2   : > { %v3138_v58 = vpop.f32.mrf.mxu0 }
 0x2c3   : > { %v3143_v62 = vcombine.low %v3136_v17, %v3138_v58  ;;  %v1983_v58 = vcombine.low %v6485_v54, %v6489_v12  ;;  %v5686_v12 = vld [vmem:[%s7124_s3 + $0x10] sm:$0xf] }
 0x2c4   : > { %v3223_v34 = vpop.f32.mrf.mxu1 }
 0x2c5   : > { %v3145_v53 = vadd.f32 %v3143_v62, %v3058_v28  ;;  %v1985_v59 = vadd.f32 %v1983_v58, %v1904_v52  ;;  %v7206_v52 = vld [vmem:[#allocation7_spill] sm:$0xff] }
 0x2c6   : > { %v3225_v46 = vpop.f32.mrf.mxu1 }
 0x2c7   : > { %v3230_v44 = vcombine.low %v3223_v34, %v3225_v46  ;;  %v2066_v62 = vadd.f32 %v2064_v60, %v1985_v59 }
 0x2c8   : > { %v3397_v6 = vpop.f32.mrf.mxu1 }
 0x2c9   : > { %v3310_v5 = vpop.f32.mrf.mxu0  ;;  %v3232_v48 = vadd.f32 %v3230_v44, %v3145_v53 }
 0x2ca   : > { %v3399_v29 = vpop.f32.mrf.mxu1 }
 0x2cb   : > { %v3312_v51 = vpop.f32.mrf.mxu0  ;;  %v3404_v57 = vcombine.low %v3397_v6, %v3399_v29 }
 0x2cc   : > { %v3317_v10 = vcombine.low %v3310_v5, %v3312_v51 }
 0x2cd   : > { %v3484_v37 = vpop.f32.mrf.mxu0 }
 0x2ce   : > { %v3319_v63 = vadd.f32 %v3317_v10, %v3232_v48 }
 0x2cf   : > { %v3486_v32 = vpop.f32.mrf.mxu0 }
 0x2d0   : > { %v3571_v17 = vpop.f32.mrf.mxu1  ;;  %v3406_v31 = vadd.f32 %v3404_v57, %v3319_v63  ;;  %v3491_v22 = vcombine.low %v3484_v37, %v3486_v32  ;;  %v5726_v63 = vld [vmem:[%s7123_s2 + $0xb4] sm:$0xf]  ;;  %v7205_v32 = vld [vmem:[#allocation6_spill] sm:$0xff] }
 0x2d2   : > { %v3573_v1 = vpop.f32.mrf.mxu1  ;;  %v3493_v39 = vadd.f32 %v3491_v22, %v3406_v31 }
 0x2d3   : > { %v3578_v34 = vcombine.low %v3571_v17, %v3573_v1 }
 0x2d4   : > { %v3658_v61 = vpop.f32.mrf.mxu0 }
 0x2d5   : > { %v3580_v46 = vadd.f32 %v3578_v34, %v3493_v39  ;;  %v7207_v34 = vld [vmem:[#allocation8_spill] sm:$0xff] }
 0x2d6   : > { %v3660_v14 = vpop.f32.mrf.mxu0 }
 0x2d7   : > { %v3665_v40 = vcombine.low %v3658_v61, %v3660_v14  ;;  %v5730_v61 = vld [vmem:[%s7123_s2 + $0xb8] sm:$0xf] }
 0x2d8   : > { %v3745_v20 = vpop.f32.mrf.mxu1 }
 0x2d9   : > { %v3667_v43 = vadd.f32 %v3665_v40, %v3580_v46 }
 0x2da   : > { %v3747_v21 = vpop.f32.mrf.mxu1 }
 0x2db   : > { %v3752_v45 = vcombine.low %v3745_v20, %v3747_v21 }
 0x2dd   : > { %v3754_v5 = vadd.f32 %v3752_v45, %v3667_v43 }
 0x2df   : > { %v6887_v6 = vadd.f32 %v3754_v5, %v2066_v62  ;;  %v5734_v62 = vld [vmem:[%s7123_s2 + $0xbc] sm:$0xf]  ;;  %v7208_v5 = vld [vmem:[#allocation9_spill] sm:$0xff] }
 0x2e1   : > { %4527 = vrot.lane.b32.xlu0 %v6887_v6, %s5830_s10  ;;  %v6893_v54 = vcombine.high %v6887_v6, %v6887_v6  ;;  %v4575_v40 = vmax.f32 %v6887_v6, 0.0 }
 0x2e3   : > { %4529 = vrot.lane.b32.xlu1 %v6893_v54, %s5830_s10 }
 0x2e5   : > { %4537 = vrot.lane.b32.xlu0 %v6887_v6, %s5829_s9 }
 0x2e7   : > { %4539 = vrot.lane.b32.xlu1 %v6893_v54, %s5829_s9 }
 0x2e9   : > { %4549 = vrot.lane.b32.xlu0 %v6887_v6, %s5832_s11 }
 0x2eb   : > { %4551 = vrot.lane.b32.xlu1 %v6893_v54, %s5832_s11 }
 0x2ed   : > { %4561 = vrot.lane.b32.xlu0 %v6887_v6, %s5833_s12 }
 0x2ef   : > { %4563 = vrot.lane.b32.xlu1 %v6893_v54, %s5833_s12  ;;  %s7048_s12 = sld [smem:[#allocation2 + $0x4]] }
 0x2f1   : > { %4576 = vrot.lane.b32.xlu0 %v6887_v6, %s5834_s13 }
 0x2f3   : > { %4578 = vrot.lane.b32.xlu1 %v6893_v54, %s5834_s13 }
 0x2f5   : > { %4588 = vrot.lane.b32.xlu0 %v6887_v6, %s5835_s14 }
 0x2f7   : > { %4590 = vrot.lane.b32.xlu1 %v6893_v54, %s5835_s14 }
 0x2f9   : > { %4600 = vrot.lane.b32.xlu0 %v6887_v6, %s5836_s15 }
 0x2fb   : > { %4602 = vrot.lane.b32.xlu1 %v6893_v54, %s5836_s15  ;;  %s5723_s15 = sld [smem:[#allocation2 + $0x5]] }
 0x2fd   : > { %4612 = vrot.lane.b32.xlu0 %v6887_v6, %s5837_s16 }
 0x2ff   : > { %4614 = vrot.lane.b32.xlu1 %v6893_v54, %s5837_s16 }
 0x301   : > { %2094 = vperm.xlu0 %5796, %v5608_v30  }
 0x303   : > { %3783 = vperm.xlu1 %5797, %v5686_v12   ;;  %v7209_v12 = vld [vmem:[#allocation10_spill] sm:$0xff] }
 0x305   : > { %4651 = vperm.xlu0 %5796, %v5725_v15  }
 0x353   : > { %v4528_v49 = vpop.permute.xlu0 %4527 }
 0x355   : > { %v4530_v2 = vpop.permute.xlu1 %4529 }
 0x356   : > { %v4531_v28 = vsel %vm276_vm2, %v4528_v49, %v4530_v2  ;;  %v4532_v44 = vsel %vm276_vm2, %v4530_v2, %v4528_v49  ;;  %v5013_v2 = vcombine.high %v4575_v40, %v4575_v40 }
 0x357   : > { %v4533_v51 = vmul.f32 %v4532_v44, %v5988_v24  ;;  %v4534_v53 = vmul.f32 %v4531_v28, %v5991_v25  ;;  %v4538_v10 = vpop.permute.xlu0 %4537 }
 0x359   : > { %v4535_v29 = vmax.f32 %v4533_v51, 0.0  ;;  %v4536_v37 = vmax.f32 %v4534_v53, 0.0  ;;  %v4540_v3 = vpop.permute.xlu1 %4539 }
 0x35a   : > { %v4541_v41 = vsel %vm299_vm0, %v4538_v10, %v4540_v3  ;;  %v4542_v48 = vsel %vm299_vm0, %v4540_v3, %v4538_v10  ;;  %v5738_v3 = vld [vmem:[%s7123_s2 + $0xc0] sm:$0xf] }
 0x35b   : > { %v4543_v57 = vmul.f32 %v4542_v48, %v5965_v13  ;;  %v4544_v24 = vmul.f32 %v4541_v41, %v7205_v32  ;;  %v4550_v17 = vpop.permute.xlu0 %4549  ;;  %5727 = vmatprep.subr.msk.mxu1 %vm521_vm3, %v4536_v37  ;;  %v5742_v41 = vld [vmem:[%s7123_s2 + $0xc4] sm:$0xf] }
 0x35c   : > { %5728 = vmatpush1.msk.msra.mxu1 %vm521_vm3, %v4535_v29 }
 0x35d   : > { %v4545_v25 = vadd.f32 %v4543_v57, %v4533_v51  ;;  %v4546_v19 = vadd.f32 %v4544_v24, %v4534_v53  ;;  %v4547_v38 = vmax.f32 %v4543_v57, 0.0  ;;  %v4548_v1 = vmax.f32 %v4544_v24, 0.0  ;;  %5729 = vmatmul.mubr.msk.f32.vlgmr.msra.gmra.mxu1 %vm517_vm5, %v5726_v63  ;;  %v4552_v31 = vpop.permute.xlu1 %4551  ;;  %v7210_v57 = vld [vmem:[#allocation11_spill] sm:$0xff]  ;;  %v7211_v24 = vld [vmem:[#allocation12_spill] sm:$0xff] }
 0x35e   : > { %v4553_v22 = vsel %vm325_vm1, %v4550_v17, %v4552_v31  ;;  %v4554_v13 = vsel %vm325_vm1, %v4552_v31, %v4550_v17  ;;  %4911 = vmatprep.mubr.f32.mxu1 %v7187_v0 }
 0x35f   : > { %v4555_v58 = vmul.f32 %v4554_v13, %v7206_v52  ;;  %v4556_v14 = vmul.f32 %v4553_v22, %v7207_v34  ;;  %v4562_v39 = vpop.permute.xlu0 %4561  ;;  %5731 = vmatprep.subr.msk.mxu0 %vm521_vm3, %v4548_v1  ;;  %v5746_v52 = vld [vmem:[%s7123_s2 + $0xc8] sm:$0xf] }
 0x360   : > { %5732 = vmatpush1.msk.msra.mxu0 %vm521_vm3, %v4547_v38 }
 0x361   : > { %v4557_v20 = vadd.f32 %v4555_v58, %v4545_v25  ;;  %v4558_v59 = vadd.f32 %v4556_v14, %v4546_v19  ;;  %v4559_v60 = vmax.f32 %v4555_v58, 0.0  ;;  %v4560_v46 = vmax.f32 %v4556_v14, 0.0  ;;  %5733 = vmatmul.mubr.msk.f32.vlgmr.msra.gmra.mxu0 %vm517_vm5, %v5730_v61  ;;  %v4564_v21 = vpop.permute.xlu1 %4563  ;;  %v6998_v19 = vpop.f32.mrf.mxu0  ;;  %v7212_v58 = vld [vmem:[#allocation13_spill] sm:$0xff]  ;;  %v7213_v14 = vld [vmem:[#allocation14_spill] sm:$0xff] }
 0x362   : > { %v4565_v43 = vsel %vm351_vm4, %v4562_v39, %v4564_v21  ;;  %v4566_v45 = vsel %vm351_vm4, %v4564_v21, %v4562_v39  ;;  %4998 = vmatprep.mubr.f32.mxu0 %v7187_v0 }
 0x363   : > { %v4567_v30 = vmul.f32 %v4566_v45, %v7208_v5  ;;  %v4568_v15 = vmul.f32 %v4565_v43, %v7209_v12  ;;  %v4577_v49 = vpop.permute.xlu0 %4576  ;;  %5735 = vmatprep.subr.msk.mxu1 %vm521_vm3, %v4560_v46  ;;  %v5750_v5 = vld [vmem:[%s7123_s2 + $0xcc] sm:$0xf]  ;;  %v7214_v12 = vld [vmem:[#allocation15_spill] sm:$0xff] }
 0x364   : > { %5736 = vmatpush1.msk.msra.mxu1 %vm521_vm3, %v4559_v60 }
 0x365   : > { %v4569_v28 = vadd.f32 %v4567_v30, %v4557_v20  ;;  %v4570_v44 = vadd.f32 %v4568_v15, %v4558_v59  ;;  %v4571_v51 = vmax.f32 %v4567_v30, 0.0  ;;  %v4572_v53 = vmax.f32 %v4568_v15, 0.0  ;;  %5737 = vmatmul.mubr.msk.f32.vlgmr.msra.gmra.mxu1 %vm517_vm5, %v5734_v62  ;;  %5743 = vmatprep.subr.msk.mxu1 %vm521_vm3, %v5013_v2  ;;  %v4579_v10 = vpop.permute.xlu1 %4578  ;;  %v7015_v20 = vpop.f32.mrf.mxu0 }
 0x366   : > { %v4580_v29 = vsel %vm380_vm6, %v4577_v49, %v4579_v10  ;;  %v4581_v37 = vsel %vm380_vm6, %v4579_v10, %v4577_v49  ;;  %5744 = vmatpush1.msk.msra.mxu1 %vm521_vm3, %v4575_v40  ;;  %5085 = vmatprep.mubr.f32.mxu1 %v7187_v0  ;;  %v7028_v30 = vpop.f32.mrf.mxu1  ;;  %v7215_v49 = vld [vmem:[#allocation16_spill] sm:$0xff] }
 0x367   : > { %v4573_v48 = vadd.f32 %v4569_v28, %v6887_v6  ;;  %v4574_v63 = vadd.f32 %v4570_v44, %v6893_v54  ;;  %v4582_v32 = vmul.f32 %v4580_v29, %v7210_v57  ;;  %v4583_v17 = vmul.f32 %v4581_v37, %v7211_v24  ;;  %v4589_v25 = vpop.permute.xlu0 %4588  ;;  %5739 = vmatprep.subr.msk.mxu0 %vm521_vm3, %v4572_v53  ;;  %v5724_v28 = vld [vmem:[%s7125_s4 + $0xa] sm:$0x3]  ;;  %v7037_v44 = vpop.f32.mrf.mxu0 }
 0x368   : > { %5740 = vmatpush1.msk.msra.mxu0 %vm521_vm3, %v4571_v51  ;;  %v3948_v57 = vpop.f32.mrf.mxu1 }
 0x369   : > { %v4584_v38 = vadd.f32 %v4582_v32, %v4573_v48  ;;  %v4585_v1 = vadd.f32 %v4583_v17, %v4574_v63  ;;  %v4586_v31 = vmax.f32 %v4582_v32, 0.0  ;;  %v4587_v22 = vmax.f32 %v4583_v17, 0.0  ;;  %5741 = vmatmul.mubr.msk.f32.vlgmr.msra.gmra.mxu0 %vm517_vm5, %v5738_v3  ;;  %v4591_v13 = vpop.permute.xlu1 %4590  ;;  %5745 = vmatmul.mubr.msk.f32.vlgmr.msra.gmra.mxu1 %vm517_vm5, %v5742_v41  ;;  %v5754_v63 = vld [vmem:[%s7123_s2 + $0xd0] sm:$0xf]  ;;  %v7216_v32 = vld [vmem:[#allocation5_spill] sm:$0xff]  ;;  %v4029_v7 = vpop.f32.mrf.mxu0 }
 0x36a   : > { %v4592_v54 = vsel %vm406_vm7, %v4589_v25, %v4591_v13  ;;  %v4593_v61 = vsel %vm406_vm7, %v4591_v13, %v4589_v25  ;;  %5172 = vmatprep.mubr.f32.mxu0 %v7187_v0  ;;  %5259 = vmatprep.mubr.f32.mxu1 %v7187_v0  ;;  %v4633_v24 = vrot.slane %v5724_v28, %v7216_v32  ;;  %v2068_v13 = vstv %s7026_s23  ;;  %v7226_v32 = vld [vmem:[#allocation23_spill] sm:$0xff] }
 0x36b   : > { %v4594_v34 = vmul.f32 %v4592_v54, %v7212_v58  ;;  %v4595_v39 = vmul.f32 %v4593_v61, %v7213_v14  ;;  %v4601_v40 = vpop.permute.xlu0 %4600  ;;  %5747 = vmatprep.subr.msk.mxu0 %vm521_vm3, %v4587_v22  ;;  %v4637_v17 = vrot.slane %v5724_v28, %v5958_v9  ;;  %v5758_v9 = vld [vmem:[%s7123_s2 + $0xd4] sm:$0xf]  ;;  %v4189_v61 = vpop.f32.mrf.mxu0  ;;  %v4034_v8 = vcombine.low %v7037_v44, %v4029_v7  ;;  %v7233_v44 = vld [vmem:[#allocation28_spill] sm:$0xff] }
 0x36c   : > { %5748 = vmatpush1.msk.msra.mxu0 %vm521_vm3, %v4586_v31  ;;  %v7220_v28 = vld [vmem:[#allocation19_spill] sm:$0xff] }
 0x36d   : > { %v4596_v59 = vadd.f32 %v4594_v34, %v4584_v38  ;;  %v4597_v60 = vadd.f32 %v4595_v39, %v4585_v1  ;;  %v4598_v46 = vmax.f32 %v4594_v34, 0.0  ;;  %v4599_v21 = vmax.f32 %v4595_v39, 0.0  ;;  %5749 = vmatmul.mubr.msk.f32.vlgmr.msra.gmra.mxu0 %vm517_vm5, %v5746_v52  ;;  %v4603_v43 = vpop.permute.xlu1 %4602 }
 0x36e   : > { %v4604_v45 = vsel %vm432_vm8, %v4601_v40, %v4603_v43  ;;  %v4605_v62 = vsel %vm432_vm8, %v4603_v43, %v4601_v40  ;;  %5346 = vmatprep.mubr.f32.mxu0 %v7187_v0  ;;  %v2069_v52 = vmul.f32 %v6847_v42, %v2068_v13  ;;  %v3757_v34 = vstv %s7048_s12  ;;  %v4191_v40 = vpop.f32.mrf.mxu0 }
 0x36f   : > { %v4606_v15 = vmul.f32 %v4604_v45, %v7214_v12  ;;  %v4607_v2 = vmul.f32 %v4605_v62, %v7215_v49  ;;  %5751 = vmatprep.subr.msk.mxu1 %vm521_vm3, %v4599_v21  ;;  %v4613_v37 = vpop.permute.xlu0 %4612  ;;  %v3758_v45 = vmul.f32 %v3757_v34, %v6408_v47  ;;  %v3872_v49 = vcombine.low %v6998_v19, %v7015_v20 }
 0x370   : > { %5752 = vmatpush1.msk.msra.mxu1 %vm521_vm3, %v4598_v46  ;;  %v3953_v47 = vcombine.low %v7028_v30, %v3948_v57  ;;  %v2588_v13 = vcombine.low %v6840_v26, %v6844_v27  ;;  %v2831_v27 = vcombine.low %v6858_v36, %v6864_v23 }
 0x371   : > { %v4608_v51 = vadd.f32 %v4606_v15, %v4596_v59  ;;  %v4609_v53 = vadd.f32 %v4607_v2, %v4597_v60  ;;  %v4610_v10 = vmax.f32 %v4606_v15, 0.0  ;;  %v4611_v29 = vmax.f32 %v4607_v2, 0.0  ;;  %5753 = vmatmul.mubr.msk.f32.vlgmr.msra.gmra.mxu1 %vm517_vm5, %v5750_v5  ;;  %v4615_v3 = vpop.permute.xlu1 %4614  ;;  %v7217_v59 = vld [vmem:[#allocation17_spill] sm:$0xff]  ;;  %v7218_v60 = vld [vmem:[#allocation18_spill] sm:$0xff]  ;;  %v4351_v2 = vpop.f32.mrf.mxu0 }
 0x372   : > { %v4616_v41 = vsel %vm458_vm9, %v4613_v37, %v4615_v3  ;;  %v4617_v48 = vsel %vm458_vm9, %v4615_v3, %v4613_v37  ;;  %5433 = vmatprep.mubr.f32.mxu1 %v7187_v0  ;;  %v7219_v46 = vcombine.low %v7217_v59, %v7218_v60  ;;  %v3778_v42 = vadd.f32 %v3776_v11, %v3758_v45  ;;  %v7223_v3 = vld [vmem:[#allocation20_spill] sm:$0xff] }
 0x373   : > { %v4618_v25 = vmul.f32 %v4616_v41, %v6159_v4  ;;  %v4619_v38 = vmul.f32 %v4617_v48, %v6171_v16  ;;  %5755 = vmatprep.subr.msk.mxu0 %vm521_vm3, %v4611_v29  ;;  %v4108_v4 = vpop.f32.mrf.mxu1  ;;  %v7224_v41 = vld [vmem:[#allocation22_spill] sm:$0xff]  ;;  %v4353_v11 = vpop.f32.mrf.mxu0 }
 0x374   : > { %5756 = vmatpush1.msk.msra.mxu0 %vm521_vm3, %v4610_v10  ;;  %v2089_v21 = vadd.f32 %v7219_v46, %v2069_v52  ;;  %v7225_v48 = vcombine.low %v7223_v3, %v7224_v41  ;;  %v7232_v52 = vld [vmem:[#allocation27_spill] sm:$0xff]  ;;  %v4358_v46 = vcombine.low %v4351_v2, %v4353_v11  ;;  %v4625_v2 = vstv %s5723_s15 }
 0x375   : > { %v4620_v1 = vadd.f32 %v4618_v25, %v4608_v51  ;;  %v4621_v0 = vadd.f32 %v4619_v38, %v4609_v53  ;;  %v4622_v31 = vmax.f32 %v4618_v25, 0.0  ;;  %v4623_v22 = vmax.f32 %v4619_v38, 0.0  ;;  %5757 = vmatmul.mubr.msk.f32.vlgmr.msra.gmra.mxu0 %vm517_vm5, %v5754_v63  ;;  %v4110_v14 = vpop.f32.mrf.mxu1  ;;  %v7221_v51 = vld [vmem:[#allocation21_spill] sm:$0xff] }
 0x376   : > { %v7222_v53 = vcombine.low %v7220_v28, %v7221_v51  ;;  %v4115_v25 = vcombine.low %v4108_v4, %v4110_v14  ;;  %v7234_v7 = vcombine.low %v7232_v52, %v7233_v44  ;;  %v2669_v4 = vcombine.low %v6842_v55, %v6850_v50 }
 0x377   : > { %v7061_v54 = vmul.f32 %v4633_v24, %v4620_v1  ;;  %v7063_v16 = vmul.f32 %v4637_v17, %v4621_v0  ;;  %5759 = vmatprep.subr.msk.mxu1 %vm521_vm3, %v4623_v22  ;;  %v4270_v5 = vpop.f32.mrf.mxu1  ;;  %v7227_v24 = vld [vmem:[#allocation25_spill] sm:$0xff]  ;;  %v7229_v1 = vld [vmem:[#allocation24_spill] sm:$0xff]  ;;  %v7230_v0 = vld [vmem:[#allocation26_spill] sm:$0xff]  ;;  %v4196_v22 = vcombine.low %v4189_v61, %v4191_v40  ;;  %v2750_v61 = vcombine.low %v6853_v18, %v6862_v33 }
 0x378   : > { %5760 = vmatpush1.msk.msra.mxu1 %vm521_vm3, %v4622_v31  ;;  %v7228_v19 = vcombine.low %v7226_v32, %v7227_v24  ;;  %v7231_v31 = vcombine.low %v7229_v1, %v7230_v0  ;;  %v4626_v18 = vmul.f32 %v4625_v2, %v6887_v6 }
 0x379   : > { %5761 = vmatmul.mubr.msk.f32.vlgmr.msra.gmra.mxu1 %vm517_vm5, %v5758_v9  ;;  %v4644_v58 = vcombine.low %v7061_v54, %v7063_v16  ;;  %v4272_v37 = vpop.f32.mrf.mxu1  ;;  %v4513_v9 = vpop.f32.mrf.mxu0 }
 0x37a   : > { %v4277_v59 = vcombine.low %v4270_v5, %v4272_v37 }
 0x37b   : > { %v4432_v38 = vpop.f32.mrf.mxu1  ;;  %v4646_v36 = vadd.f32 %v4644_v58, %v4626_v18 }
 0x37c   : > { %v2095_v39 = vpop.permute.xlu0 %2094 }
 0x37d   : > { %v2102_v43 = vrot.slane %v2095_v39, %v6396_v35  ;;  %v4434_v60 = vpop.f32.mrf.mxu1 }
 0x37e   : > { %v3784_v62 = vpop.permute.xlu1 %3783  ;;  %v4439_v45 = vcombine.low %v4432_v38, %v4434_v60 }
 0x37f   : > { %v2104_v12 = vadd.f32 %v2102_v43, %v2089_v21  ;;  %v3791_v15 = vrot.slane %v3784_v62, %v6396_v35  ;;  %v4515_v43 = vpop.f32.mrf.mxu0 }
 0x380   : > { %v4520_v5 = vcombine.low %v4513_v9, %v4515_v43  ;;  %v4652_v28 = vpop.permute.xlu0 %4651 }
 0x381   : > { %v2185_v10 = vadd.f32 %v7222_v53, %v2104_v12  ;;  %v3793_v29 = vadd.f32 %v3791_v15, %v3778_v42  ;;  %v4659_v33 = vrot.slane %v4652_v28, %v6396_v35 }
 0x383   : > { %v2266_v63 = vadd.f32 %v7225_v48, %v2185_v10  ;;  %v3874_v56 = vadd.f32 %v3872_v49, %v3793_v29  ;;  %v4661_v37 = vadd.f32 %v4659_v33, %v4646_v36 }
 0x385   : > { %v2347_v20 = vadd.f32 %v7228_v19, %v2266_v63  ;;  %v3955_v17 = vadd.f32 %v3953_v47, %v3874_v56 }
 0x387   : > { %v2428_v30 = vadd.f32 %v7231_v31, %v2347_v20  ;;  %v4036_v57 = vadd.f32 %v4034_v8, %v3955_v17 }
 0x389   : > { %v2509_v34 = vadd.f32 %v7234_v7, %v2428_v30  ;;  %v4117_v39 = vadd.f32 %v4115_v25, %v4036_v57 }
 0x38b   : > { %v4198_v14 = vadd.f32 %v4196_v22, %v4117_v39  ;;  %v2590_v21 = vadd.f32 %v2588_v13, %v2509_v34 }
 0x38d   : > { %v4279_v40 = vadd.f32 %v4277_v59, %v4198_v14  ;;  %v2671_v26 = vadd.f32 %v2669_v4, %v2590_v21 }
 0x38f   : > { %v4360_v62 = vadd.f32 %v4358_v46, %v4279_v40  ;;  %v2752_v12 = vadd.f32 %v2750_v61, %v2671_v26 }
 0x391   : > { %v4441_v42 = vadd.f32 %v4439_v45, %v4360_v62  ;;  %v2833_v15 = vadd.f32 %v2831_v27, %v2752_v12 }
 0x393   : > { %v4522_v49 = vadd.f32 %v4520_v5, %v4441_v42 }
 0x395   : > { %v4523_v55 = vadd.f32 %v4522_v49, %v2833_v15 }
 0x41d   : > { %v4739_v50 = vpop.f32.mrf.mxu1 }
 0x41f   : > { %v4741_v53 = vpop.f32.mrf.mxu1 }
 0x420   : > { %v4746_v23 = vcombine.low %v4739_v50, %v4741_v53 }
 0x421   : > { %v4826_v51 = vpop.f32.mrf.mxu0 }
 0x422   : > { %v4748_v63 = vadd.f32 %v4746_v23, %v4661_v37 }
 0x423   : > { %v4828_v10 = vpop.f32.mrf.mxu0 }
 0x424   : > { %v4833_v3 = vcombine.low %v4826_v51, %v4828_v10 }
 0x425   : > { %v4913_v29 = vpop.f32.mrf.mxu1 }
 0x426   : > { %v4835_v11 = vadd.f32 %v4833_v3, %v4748_v63 }
 0x427   : > { %v4915_v47 = vpop.f32.mrf.mxu1 }
 0x428   : > { %v4920_v56 = vcombine.low %v4913_v29, %v4915_v47 }
 0x429   : > { %v5000_v41 = vpop.f32.mrf.mxu0  ;;  %v5087_v48 = vpop.f32.mrf.mxu1 }
 0x42a   : > { %v4922_v35 = vadd.f32 %v4920_v56, %v4835_v11 }
 0x42b   : > { %v5002_v8 = vpop.f32.mrf.mxu0  ;;  %v5089_v6 = vpop.f32.mrf.mxu1 }
 0x42c   : > { %v5007_v32 = vcombine.low %v5000_v41, %v5002_v8  ;;  %v5094_v20 = vcombine.low %v5087_v48, %v5089_v6 }
 0x42d   : > { %v5174_v24 = vpop.f32.mrf.mxu0 }
 0x42e   : > { %v5009_v19 = vadd.f32 %v5007_v32, %v4922_v35 }
 0x42f   : > { %v5176_v17 = vpop.f32.mrf.mxu0 }
 0x430   : > { %v5096_v58 = vadd.f32 %v5094_v20, %v5009_v19  ;;  %v5181_v25 = vcombine.low %v5174_v24, %v5176_v17 }
 0x431   : > { %v5261_v54 = vpop.f32.mrf.mxu1 }
 0x432   : > { %v5183_v31 = vadd.f32 %v5181_v25, %v5096_v58 }
 0x433   : > { %v5263_v16 = vpop.f32.mrf.mxu1 }
 0x434   : > { %v5268_v1 = vcombine.low %v5261_v54, %v5263_v16 }
 0x435   : > { %v5348_v38 = vpop.f32.mrf.mxu0 }
 0x436   : > { %v5270_v22 = vadd.f32 %v5268_v1, %v5183_v31 }
 0x437   : > { %v5350_v0 = vpop.f32.mrf.mxu0 }
 0x438   : > { %v5355_v30 = vcombine.low %v5348_v38, %v5350_v0 }
 0x439   : > { %v5435_v57 = vpop.f32.mrf.mxu1 }
 0x43a   : > { %v5357_v13 = vadd.f32 %v5355_v30, %v5270_v22 }
 0x43b   : > { %v5437_v9 = vpop.f32.mrf.mxu1 }
 0x43c   : > { %v5442_v52 = vcombine.low %v5435_v57, %v5437_v9 }
 0x43e   : > { %v5444_v44 = vadd.f32 %v5442_v52, %v5357_v13 }
 0x440   : > { %v5445_v7 = vadd.f32 %v5444_v44, %v4523_v55 }
 0x442   : > { %5446 = vst [vmem:[%s265_s25] sm:$0xff] %v5445_v7 }
 0x443 PF: > { %s17_s21 = sadd.s32 1, %s5825_s21  }
 0x444   : > { %p14_p1 = scmp.ge.s32.totalorder %s17_s21, 4  }
 0x446   :  { %16 = sbr.rel (!%p14_p1) target bundleno = 1 (0x1), region = 149 }
 0x44b   :  { %5468 = vsyncpa [#allocation3], 1 }
 0x44c   :  { %5470 = vsyncpa [#allocation3 + $0x1], 1 }

</bundles_post_ra>
